<compile_context>
chip_gen: v7x
topology: tpu7x:2x2x1
jax: 0.10.0
libtpu: 0.0.40
codegen_flags: <defaults>
</compile_context>

<pallas_src>
import functools

import jax
import jax.numpy as jnp
from jax.experimental import pallas as pl
from jax.experimental.pallas import tpu as pltpu


SIZE = 16            # image spatial size
STYLE_DIM = 32
MOTION_DIM = 8
CONV_CH = 16
FFN_DIM = 64
HALF = SIZE // 2     # after the stride-2 conv
LANES = 128          # TPU lane width; narrow channel outputs are padded to this


def _full_spec(shape):
    nd = len(shape)
    return pl.BlockSpec(shape, lambda i, _nd=nd: (0,) * _nd)


# ----------------------------------------------------------------------------
# Pallas kernel 1: batched 3x3/s2 conv (im2col matmul) + bias + LeakyReLU
#   one MXU pass computes enc AND enc2 conv features for source AND drive
#   (weights concatenated along N, patches stacked along M).
# ----------------------------------------------------------------------------
def _conv_lrelu_kernel(p_ref, w_ref, b_ref, o_ref):
    acc = jnp.dot(p_ref[...], w_ref[...], preferred_element_type=jnp.float32)
    acc = acc + b_ref[...]
    # TODO(synk): slope 0.2 is the StyleGAN convention; torch default is 0.01.
    acc = jnp.where(acc >= 0.0, acc, 0.2 * acc)
    o_ref[...] = acc.astype(o_ref.dtype)


def conv_lrelu(patches, w, b, tile_m=256):
    M, K = patches.shape
    N = w.shape[1]                       # padded to LANES -> lane-dense stores
    tile_m = min(tile_m, M)
    # TODO(synk): at production resolutions raise tile_m (512-2048 rows) and
    # set pltpu.CompilerParams(vmem_limit_bytes=...) with headroom.
    return pl.pallas_call(
        _conv_lrelu_kernel,
        out_shape=jax.ShapeDtypeStruct((M, N), jnp.bfloat16),
        grid=(pl.cdiv(M, tile_m),),
        in_specs=[pl.BlockSpec((tile_m, K), lambda i: (i, 0)),
                  pl.BlockSpec((K, N), lambda i: (0, 0)),
                  pl.BlockSpec((1, N), lambda i: (0, 0))],
        out_specs=pl.BlockSpec((tile_m, N), lambda i: (i, 0)),
        compiler_params=pltpu.CompilerParams(
            dimension_semantics=("parallel",)),
    )(patches, w, b)


# ----------------------------------------------------------------------------
# Pallas kernel 2: fused decoder
#   encoder FCs (enc|enc2, 3 images, one dot) -> res_s/source/drive styles,
#   transformer layer 0 (source) + layer 1 (drive), motion delta, w,
#   gamma/beta affines (one dot), SFT modulation + LeakyReLU + 1x1 toRGB.
# ----------------------------------------------------------------------------
def _decoder_kernel(flat_ref, fcw_ref, fcb_ref, dir_ref,
                    wv0_ref, wo0_ref, w10_ref, b10_ref, w20_ref, b20_ref,
                    wv1_ref, wo1_ref, w11_ref, b11_ref, w21_ref, b21_ref,
                    sftw_ref, sftb_ref, feat_ref, rgbw_ref, rgbb_ref,
                    o_ref, *, batch):
    B = batch
    L = dir_ref.shape[0]
    D = dir_ref.shape[1]
    C = feat_ref.shape[1]
    HH = feat_ref.shape[0] // B

    # ---- encoder FCs: [enc(src); enc2(src); enc2(drv)] x [enc.fc | enc2.fc] --
    h_all = jnp.dot(flat_ref[...], fcw_ref[...],
                    preferred_element_type=jnp.float32) + fcb_ref[...]
    res_s = h_all[0:B, 0:D]                 # EncoderApp3(img_source)
    source = h_all[B:2 * B, D:2 * D]        # EncoderApp(img_source)
    drive = h_all[2 * B:3 * B, D:2 * D]     # EncoderApp(img_drive)

    drc = dir_ref[...]                      # (L, D) learned direction queries

    def tlayer(mem, wv, wo, w1, b1, w2, b2):
        # Cross-attention over a length-1 memory: softmax over one key == 1,
        # so the context is exactly the V projection; wq/wk/scale/exp are
        # mathematically dead and are not computed here.
        # TODO(synk): reinstate Q/K/softmax if the real Synthesis_transformer
        # attends over >1 memory token.
        ctx = jnp.dot(mem.astype(jnp.bfloat16), wv,
                      preferred_element_type=jnp.float32)
        ctx = jnp.dot(ctx.astype(jnp.bfloat16), wo,
                      preferred_element_type=jnp.float32)            # (B, D)
        h = (drc[None, :, :] + ctx[:, None, :]).reshape(B * L, D)    # (B*L, D)
        f = jnp.dot(h.astype(jnp.bfloat16), w1,
                    preferred_element_type=jnp.float32) + b1
        f = jnp.maximum(f, 0.0)
        f = jnp.dot(f.astype(jnp.bfloat16), w2,
                    preferred_element_type=jnp.float32) + b2
        return h + f                                                 # (B*L, D)

    out0 = tlayer(source, wv0_ref[...], wo0_ref[...], w10_ref[...],
                  b10_ref[...], w20_ref[...], b20_ref[...])
    out1 = tlayer(drive, wv1_ref[...], wo1_ref[...], w11_ref[...],
                  b11_ref[...], w21_ref[...], b21_ref[...])

    # motion delta = mean over the L direction queries
    delta = (out1 - out0).reshape(B, L, D).sum(axis=1) * (1.0 / L)   # (B, D)
    w_lat = res_s + delta                                            # (B, D)

    # ---- SFT affines: gamma | beta in one dot ----
    gb = jnp.dot(w_lat.astype(jnp.bfloat16), sftw_ref[...],
                 preferred_element_type=jnp.float32) + sftb_ref[...]  # (B, 2C)
    gamma = gb[:, 0:C]
    beta = gb[:, C:2 * C]

    # ---- SFT modulation + LeakyReLU + 1x1 toRGB (computed at HALF res;
    #      per-batch gamma/beta broadcast in-register, no HBM materialization)
    feat = feat_ref[...].astype(jnp.float32).reshape(B, HH, C)
    x = feat * (1.0 + gamma[:, None, :]) + beta[:, None, :]
    x = jnp.where(x >= 0.0, x, 0.2 * x)
    x = x.reshape(B * HH, C)
    rgb = jnp.dot(x.astype(jnp.bfloat16), rgbw_ref[...],
                  preferred_element_type=jnp.float32) + rgbb_ref[...]
    o_ref[...] = rgb.astype(o_ref.dtype)     # lane-dense (B*HH, 128) store


def decoder_fused(flat_all, feat_half, pp, batch):
    n_rows = feat_half.shape[0]
    args = [flat_all, pp["fc_w"], pp["fc_b"], pp["direction"],
            pp["wv0"], pp["wo0"], pp["w1_0"], pp["b1_0"], pp["w2_0"], pp["b2_0"],
            pp["wv1"], pp["wo1"], pp["w1_1"], pp["b1_1"], pp["w2_1"], pp["b2_1"],
            pp["sft_w"], pp["sft_b"], feat_half, pp["rgb_w"], pp["rgb_b"]]
    return pl.pallas_call(
        functools.partial(_decoder_kernel, batch=batch),
        out_shape=jax.ShapeDtypeStruct((n_rows, LANES), jnp.float32),
        grid=(1,),
        in_specs=[_full_spec(a.shape) for a in args],
        out_specs=_full_spec((n_rows, LANES)),
    )(*args)


# ----------------------------------------------------------------------------
# glue: im2col (3x3, stride 2, pad 1) -- NHWC
# TODO(synk): fuse im2col into the conv kernel (per-tile in VMEM) for
# production resolutions to avoid the 9x patch blow-up in HBM.
# ----------------------------------------------------------------------------
def im2col(x, k=3, stride=2, pad=1):
    B, H, W, C = x.shape
    xp = jnp.pad(x, ((0, 0), (pad, pad), (pad, pad), (0, 0)))
    Ho = (H + 2 * pad - k) // stride + 1
    Wo = (W + 2 * pad - k) // stride + 1
    cols = []
    for di in range(k):
        for dj in range(k):
            cols.append(xp[:, di:di + stride * Ho:stride,
                           dj:dj + stride * Wo:stride, :])
    patches = jnp.concatenate(cols, axis=-1)            # (B, Ho, Wo, k*k*C)
    return patches.reshape(B * Ho * Wo, k * k * C), (B, Ho, Wo)


# ----------------------------------------------------------------------------
# parameters
# ----------------------------------------------------------------------------
def _normal(key, shape, scale=0.05):
    return scale * jax.random.normal(key, shape, dtype=jnp.float32)


def init_params(key):
    counter = [0]

    def nk():
        counter[0] += 1
        return jax.random.fold_in(key, counter[0])

    patch_dim = 9 * 3
    flat_dim = HALF * HALF * CONV_CH

    def enc_params():
        return {"conv_w": _normal(nk(), (patch_dim, CONV_CH)),
                "conv_b": _normal(nk(), (CONV_CH,)),
                "fc_w": _normal(nk(), (flat_dim, STYLE_DIM)),
                "fc_b": _normal(nk(), (STYLE_DIM,))}

    def tlayer_params():
        return {
            # wq/wk kept for structural fidelity with the reference module;
            # they are no-ops for a length-1 memory and are not packed into
            # the fused kernel.
            "wq": _normal(nk(), (STYLE_DIM, STYLE_DIM)),
            "wk": _normal(nk(), (STYLE_DIM, STYLE_DIM)),
            "wv": _normal(nk(), (STYLE_DIM, STYLE_DIM)),
            "wo": _normal(nk(), (STYLE_DIM, STYLE_DIM)),
            "w1": _normal(nk(), (STYLE_DIM, FFN_DIM)),
            "b1": _normal(nk(), (FFN_DIM,)),
            "w2": _normal(nk(), (FFN_DIM, STYLE_DIM)),
            "b2": _normal(nk(), (STYLE_DIM,)),
        }

    return {
        "enc": enc_params(),       # EncoderApp3
        "enc2": enc_params(),      # EncoderApp
        "dec": {
            "direction": _normal(nk(), (MOTION_DIM, STYLE_DIM)),
            "tlayer0": tlayer_params(),
            "tlayer1": tlayer_params(),
            "sft_gamma_w": _normal(nk(), (STYLE_DIM, CONV_CH)),
            "sft_gamma_b": _normal(nk(), (CONV_CH,)),
            "sft_beta_w": _normal(nk(), (STYLE_DIM, CONV_CH)),
            "sft_beta_b": _normal(nk(), (CONV_CH,)),
            "rgb_w": _normal(nk(), (CONV_CH, 3)),
            "rgb_b": _normal(nk(), (3,)),
        },
    }


def prepare_params(p):
    """Pack / pad / bf16-cast weights once, outside the jitted forward."""
    def bf(x):
        return x.astype(jnp.bfloat16)

    def frow(x):
        return x.reshape(1, -1).astype(jnp.float32)

    d = p["dec"]
    conv_w = jnp.concatenate([p["enc"]["conv_w"], p["enc2"]["conv_w"]], axis=1)
    conv_b = jnp.concatenate([p["enc"]["conv_b"], p["enc2"]["conv_b"]])
    conv_w = jnp.pad(conv_w, ((0, 0), (0, LANES - conv_w.shape[1])))
    conv_b = jnp.pad(conv_b, (0, LANES - conv_b.shape[0]))

    fc_w = jnp.concatenate([p["enc"]["fc_w"], p["enc2"]["fc_w"]], axis=1)
    fc_b = jnp.concatenate([p["enc"]["fc_b"], p["enc2"]["fc_b"]])

    sft_w = jnp.concatenate([d["sft_gamma_w"], d["sft_beta_w"]], axis=1)
    sft_b = jnp.concatenate([d["sft_gamma_b"], d["sft_beta_b"]])

    rgb_w = jnp.pad(d["rgb_w"], ((0, 0), (0, LANES - d["rgb_w"].shape[1])))
    rgb_b = jnp.pad(d["rgb_b"], (0, LANES - d["rgb_b"].shape[0]))

    out = {
        "conv_w": bf(conv_w), "conv_b": frow(conv_b),
        "fc_w": bf(fc_w), "fc_b": frow(fc_b),
        "direction": d["direction"].astype(jnp.float32),
        "sft_w": bf(sft_w), "sft_b": frow(sft_b),
        "rgb_w": bf(rgb_w), "rgb_b": frow(rgb_b),
    }
    for i in (0, 1):
        t = d["tlayer%d" % i]
        out["wv%d" % i] = bf(t["wv"])
        out["wo%d" % i] = bf(t["wo"])
        out["w1_%d" % i] = bf(t["w1"])
        out["b1_%d" % i] = frow(t["b1"])
        out["w2_%d" % i] = bf(t["w2"])
        out["b2_%d" % i] = frow(t["b2"])
    return out


# ----------------------------------------------------------------------------
# forward
# ----------------------------------------------------------------------------
def generator_forward(pp, img_source_nchw, img_drive_nchw):
    B = img_source_nchw.shape[0]
    src = jnp.transpose(img_source_nchw, (0, 2, 3, 1)).astype(jnp.float32)
    drv = jnp.transpose(img_drive_nchw, (0, 2, 3, 1)).astype(jnp.float32)

    # im2col both images, stacked along M -> one conv matmul for enc+enc2.
    p_src, (_, Ho, Wo) = im2col(src)
    p_drv, _ = im2col(drv)
    patches = jnp.concatenate([p_src, p_drv], axis=0).astype(jnp.bfloat16)

    conv_out = conv_lrelu(patches, pp["conv_w"], pp["conv_b"])  # (2*B*HH, 128)
    hw = B * Ho * Wo
    conv_src = conv_out[:hw]
    conv_drv = conv_out[hw:]
    # enc (EncoderApp3) channels live in cols [0:C), enc2 in cols [C:2C).
    feat_enc_src = conv_src[:, :CONV_CH]                        # feats for SFT
    # NOTE: flatten order here is NHWC (y, x, c); permute fc_w when loading
    # real PyTorch (NCHW-flatten) checkpoints.
    flat_enc_src = conv_src[:, :CONV_CH].reshape(B, Ho * Wo * CONV_CH)
    flat_enc2_src = conv_src[:, CONV_CH:2 * CONV_CH].reshape(B, Ho * Wo * CONV_CH)
    flat_enc2_drv = conv_drv[:, CONV_CH:2 * CONV_CH].reshape(B, Ho * Wo * CONV_CH)
    flat_all = jnp.concatenate([flat_enc_src, flat_enc2_src, flat_enc2_drv],
                               axis=0)                           # (3B, 1024)

    rgb = decoder_fused(flat_all, feat_enc_src, pp, B)           # (B*HH, 128)
    rgb = rgb[:, :3].reshape(B, HALF, HALF, 3)
    # Nearest-neighbour upsample HALF->SIZE applied to the RGB output: it
    # commutes exactly with the per-batch SFT, LeakyReLU and 1x1 toRGB conv,
    # so this equals upsampling the feature map first (as the reference does)
    # at 4x less kernel work and no HBM materialization of the upsampled map.
    img = jnp.repeat(jnp.repeat(rgb, 2, axis=1), 2, axis=2)      # (B, S, S, 3)
    return jnp.transpose(img, (0, 3, 1, 2))                      # NCHW


# ----------------------------------------------------------------------------
if __name__ == "__main__":
    key = jax.random.PRNGKey(0)
    k_par, k_src, k_drv = jax.random.split(key, 3)

    params = init_params(k_par)
    packed = prepare_params(params)        # hoisted packing/casting (once)

    img_source = jax.random.normal(k_src, (2, 3, SIZE, SIZE), dtype=jnp.float32)
    img_drive = jax.random.normal(k_drv, (2, 3, SIZE, SIZE), dtype=jnp.float32)

    fwd = jax.jit(generator_forward)
    out = fwd(packed, img_source, img_drive)
    out = jax.block_until_ready(out)
    assert out.shape == (2, 3, SIZE, SIZE), out.shape
    assert bool(jnp.all(jnp.isfinite(out)))
    print("KERNEL_OK")
</pallas_src>

<mosaic_0001>
module attributes {stable_mosaic.version = 11 : i64} {
  func.func @_conv_lrelu_kernel(%arg0: i32, %arg1: memref<256x27xbf16, #tpu.memory_space<vmem>>, %arg2: memref<27x128xbf16, #tpu.memory_space<vmem>>, %arg3: memref<1x128xf32, #tpu.memory_space<vmem>>, %arg4: memref<256x128xbf16, #tpu.memory_space<vmem>>) attributes {dimension_semantics = [#tpu.dimension_semantics<parallel>], iteration_bounds = array<i64: 1>, scalar_prefetch = 0 : i64, scratch_operands = 0 : i64, tpu.core_type = #tpu.core_type<tc>, window_params = [{transform_indices = @transform_0, window_bounds = array<i64: 256, 27>}, {pipeline_mode = #tpu.pipeline_mode<synchronous>, transform_indices = @transform_1, window_bounds = array<i64: 27, 128>}, {pipeline_mode = #tpu.pipeline_mode<synchronous>, transform_indices = @transform_2, window_bounds = array<i64: 1, 128>}, {transform_indices = @transform_3, window_bounds = array<i64: 256, 128>}]} {
    %c0 = arith.constant 0 : index
    %c0_0 = arith.constant 0 : index
    %0 = vector.load %arg1[%c0, %c0_0] : memref<256x27xbf16, #tpu.memory_space<vmem>>, vector<256x27xbf16>
    %c0_1 = arith.constant 0 : index
    %c0_2 = arith.constant 0 : index
    %1 = vector.load %arg2[%c0_1, %c0_2] : memref<27x128xbf16, #tpu.memory_space<vmem>>, vector<27x128xbf16>
    %cst = arith.constant dense<0.000000e+00> : vector<256x128xf32>
    %2 = tpu.matmul %0, %1, %cst {dimension_numbers = #tpu.dot_dimension_numbers<[1], [0], [0], [1], [0, 0, 1, 1], [], []>} : vector<256x27xbf16>, vector<27x128xbf16>, vector<256x128xf32> -> vector<256x128xf32>
    %c0_3 = arith.constant 0 : index
    %c0_4 = arith.constant 0 : index
    %3 = vector.load %arg3[%c0_3, %c0_4] : memref<1x128xf32, #tpu.memory_space<vmem>>, vector<1x128xf32>
    %4 = vector.broadcast %3 : vector<1x128xf32> to vector<256x128xf32>
    %5 = arith.addf %2, %4 : vector<256x128xf32>
    %cst_5 = arith.constant 0.000000e+00 : f32
    %6 = vector.broadcast %cst_5 : f32 to vector<256x128xf32>
    %7 = arith.cmpf oge, %5, %6 : vector<256x128xf32>
    %cst_6 = arith.constant 2.000000e-01 : f32
    %8 = vector.broadcast %cst_6 : f32 to vector<256x128xf32>
    %9 = arith.mulf %8, %5 : vector<256x128xf32>
    %10 = arith.select %7, %5, %9 : vector<256x128xi1>, vector<256x128xf32>
    %11 = arith.truncf %10 : vector<256x128xf32> to vector<256x128xbf16>
    %c0_7 = arith.constant 0 : index
    %c0_8 = arith.constant 0 : index
    %12 = vector.load %arg4[%c0_7, %c0_8] : memref<256x128xbf16, #tpu.memory_space<vmem>>, vector<256x128xbf16>
    tpu.vector_store %arg4[%c0_7, %c0_8], %11 {strides = array<i32>} : memref<256x128xbf16, #tpu.memory_space<vmem>>, vector<256x128xbf16>,
    return
  }
  func.func @transform_0(%arg0: i32) -> (i32, i32) {
    %c0_i32 = arith.constant 0 : i32
    %c0_i32_0 = arith.constant 0 : i32
    return %arg0, %c0_i32 : i32, i32
  }
  func.func @transform_1(%arg0: i32) -> (i32, i32) {
    %c0_i32 = arith.constant 0 : i32
    %c0_i32_0 = arith.constant 0 : i32
    %c0_i32_1 = arith.constant 0 : i32
    return %c0_i32, %c0_i32_0 : i32, i32
  }
  func.func @transform_2(%arg0: i32) -> (i32, i32) {
    %c0_i32 = arith.constant 0 : i32
    %c0_i32_0 = arith.constant 0 : i32
    %c0_i32_1 = arith.constant 0 : i32
    return %c0_i32, %c0_i32_0 : i32, i32
  }
  func.func @transform_3(%arg0: i32) -> (i32, i32) {
    %c0_i32 = arith.constant 0 : i32
    %c0_i32_0 = arith.constant 0 : i32
    return %arg0, %c0_i32 : i32, i32
  }
}

module attributes {stable_mosaic.version = 11 : i64} {
  func.func @_decoder_kernel(%arg0: i32, %arg1: memref<6x1024xbf16, #tpu.memory_space<vmem>>, %arg2: memref<1024x64xbf16, #tpu.memory_space<vmem>>, %arg3: memref<1x64xf32, #tpu.memory_space<vmem>>, %arg4: memref<8x32xf32, #tpu.memory_space<vmem>>, %arg5: memref<32x32xbf16, #tpu.memory_space<vmem>>, %arg6: memref<32x32xbf16, #tpu.memory_space<vmem>>, %arg7: memref<32x64xbf16, #tpu.memory_space<vmem>>, %arg8: memref<1x64xf32, #tpu.memory_space<vmem>>, %arg9: memref<64x32xbf16, #tpu.memory_space<vmem>>, %arg10: memref<1x32xf32, #tpu.memory_space<vmem>>, %arg11: memref<32x32xbf16, #tpu.memory_space<vmem>>, %arg12: memref<32x32xbf16, #tpu.memory_space<vmem>>, %arg13: memref<32x64xbf16, #tpu.memory_space<vmem>>, %arg14: memref<1x64xf32, #tpu.memory_space<vmem>>, %arg15: memref<64x32xbf16, #tpu.memory_space<vmem>>, %arg16: memref<1x32xf32, #tpu.memory_space<vmem>>, %arg17: memref<32x32xbf16, #tpu.memory_space<vmem>>, %arg18: memref<1x32xf32, #tpu.memory_space<vmem>>, %arg19: memref<128x16xbf16, #tpu.memory_space<vmem>>, %arg20: memref<16x128xbf16, #tpu.memory_space<vmem>>, %arg21: memref<1x128xf32, #tpu.memory_space<vmem>>, %arg22: memref<128x128xf32, #tpu.memory_space<vmem>>) attributes {dimension_semantics = [#tpu.dimension_semantics<arbitrary>], iteration_bounds = array<i64: 1>, scalar_prefetch = 0 : i64, scratch_operands = 0 : i64, tpu.core_type = #tpu.core_type<tc>, window_params = [{pipeline_mode = #tpu.pipeline_mode<synchronous>, transform_indices = @transform_0, window_bounds = array<i64: 6, 1024>}, {pipeline_mode = #tpu.pipeline_mode<synchronous>, transform_indices = @transform_1, window_bounds = array<i64: 1024, 64>}, {pipeline_mode = #tpu.pipeline_mode<synchronous>, transform_indices = @transform_2, window_bounds = array<i64: 1, 64>}, {pipeline_mode = #tpu.pipeline_mode<synchronous>, transform_indices = @transform_3, window_bounds = array<i64: 8, 32>}, {pipeline_mode = #tpu.pipeline_mode<synchronous>, transform_indices = @transform_4, window_bounds = array<i64: 32, 32>}, {pipeline_mode = #tpu.pipeline_mode<synchronous>, transform_indices = @transform_5, window_bounds = array<i64: 32, 32>}, {pipeline_mode = #tpu.pipeline_mode<synchronous>, transform_indices = @transform_6, window_bounds = array<i64: 32, 64>}, {pipeline_mode = #tpu.pipeline_mode<synchronous>, transform_indices = @transform_7, window_bounds = array<i64: 1, 64>}, {pipeline_mode = #tpu.pipeline_mode<synchronous>, transform_indices = @transform_8, window_bounds = array<i64: 64, 32>}, {pipeline_mode = #tpu.pipeline_mode<synchronous>, transform_indices = @transform_9, window_bounds = array<i64: 1, 32>}, {pipeline_mode = #tpu.pipeline_mode<synchronous>, transform_indices = @transform_10, window_bounds = array<i64: 32, 32>}, {pipeline_mode = #tpu.pipeline_mode<synchronous>, transform_indices = @transform_11, window_bounds = array<i64: 32, 32>}, {pipeline_mode = #tpu.pipeline_mode<synchronous>, transform_indices = @transform_12, window_bounds = array<i64: 32, 64>}, {pipeline_mode = #tpu.pipeline_mode<synchronous>, transform_indices = @transform_13, window_bounds = array<i64: 1, 64>}, {pipeline_mode = #tpu.pipeline_mode<synchronous>, transform_indices = @transform_14, window_bounds = array<i64: 64, 32>}, {pipeline_mode = #tpu.pipeline_mode<synchronous>, transform_indices = @transform_15, window_bounds = array<i64: 1, 32>}, {pipeline_mode = #tpu.pipeline_mode<synchronous>, transform_indices = @transform_16, window_bounds = array<i64: 32, 32>}, {pipeline_mode = #tpu.pipeline_mode<synchronous>, transform_indices = @transform_17, window_bounds = array<i64: 1, 32>}, {pipeline_mode = #tpu.pipeline_mode<synchronous>, transform_indices = @transform_18, window_bounds = array<i64: 128, 16>}, {pipeline_mode = #tpu.pipeline_mode<synchronous>, transform_indices = @transform_19, window_bounds = array<i64: 16, 128>}, {pipeline_mode = #tpu.pipeline_mode<synchronous>, transform_indices = @transform_20, window_bounds = array<i64: 1, 128>}, {pipeline_mode = #tpu.pipeline_mode<synchronous>, transform_indices = @transform_21, window_bounds = array<i64: 128, 128>}]} {
    %c0 = arith.constant 0 : index
    %c0_0 = arith.constant 0 : index
    %0 = vector.load %arg1[%c0, %c0_0] : memref<6x1024xbf16, #tpu.memory_space<vmem>>, vector<6x1024xbf16>
    %c0_1 = arith.constant 0 : index
    %c0_2 = arith.constant 0 : index
    %1 = vector.load %arg2[%c0_1, %c0_2] : memref<1024x64xbf16, #tpu.memory_space<vmem>>, vector<1024x64xbf16>
    %cst = arith.constant dense<0.000000e+00> : vector<6x64xf32>
    %2 = tpu.matmul %0, %1, %cst {dimension_numbers = #tpu.dot_dimension_numbers<[1], [0], [0], [1], [0, 0, 1, 1], [], []>} : vector<6x1024xbf16>, vector<1024x64xbf16>, vector<6x64xf32> -> vector<6x64xf32>
    %c0_3 = arith.constant 0 : index
    %c0_4 = arith.constant 0 : index
    %3 = vector.load %arg3[%c0_3, %c0_4] : memref<1x64xf32, #tpu.memory_space<vmem>>, vector<1x64xf32>
    %4 = vector.broadcast %3 : vector<1x64xf32> to vector<6x64xf32>
    %5 = arith.addf %2, %4 : vector<6x64xf32>
    %6 = vector.extract_strided_slice %5 {offsets = [0, 0], sizes = [2, 32], strides = [1, 1]} : vector<6x64xf32> to vector<2x32xf32>
    %7 = vector.extract_strided_slice %5 {offsets = [2, 32], sizes = [2, 32], strides = [1, 1]} : vector<6x64xf32> to vector<2x32xf32>
    %8 = vector.extract_strided_slice %5 {offsets = [4, 32], sizes = [2, 32], strides = [1, 1]} : vector<6x64xf32> to vector<2x32xf32>
    %c0_5 = arith.constant 0 : index
    %c0_6 = arith.constant 0 : index
    %9 = vector.load %arg4[%c0_5, %c0_6] : memref<8x32xf32, #tpu.memory_space<vmem>>, vector<8x32xf32>
    %c0_7 = arith.constant 0 : index
    %c0_8 = arith.constant 0 : index
    %10 = vector.load %arg5[%c0_7, %c0_8] : memref<32x32xbf16, #tpu.memory_space<vmem>>, vector<32x32xbf16>
    %c0_9 = arith.constant 0 : index
    %c0_10 = arith.constant 0 : index
    %11 = vector.load %arg6[%c0_9, %c0_10] : memref<32x32xbf16, #tpu.memory_space<vmem>>, vector<32x32xbf16>
    %c0_11 = arith.constant 0 : index
    %c0_12 = arith.constant 0 : index
    %12 = vector.load %arg7[%c0_11, %c0_12] : memref<32x64xbf16, #tpu.memory_space<vmem>>, vector<32x64xbf16>
    %c0_13 = arith.constant 0 : index
    %c0_14 = arith.constant 0 : index
    %13 = vector.load %arg8[%c0_13, %c0_14] : memref<1x64xf32, #tpu.memory_space<vmem>>, vector<1x64xf32>
    %c0_15 = arith.constant 0 : index
    %c0_16 = arith.constant 0 : index
    %14 = vector.load %arg9[%c0_15, %c0_16] : memref<64x32xbf16, #tpu.memory_space<vmem>>, vector<64x32xbf16>
    %c0_17 = arith.constant 0 : index
    %c0_18 = arith.constant 0 : index
    %15 = vector.load %arg10[%c0_17, %c0_18] : memref<1x32xf32, #tpu.memory_space<vmem>>, vector<1x32xf32>
    %16 = arith.truncf %7 : vector<2x32xf32> to vector<2x32xbf16>
    %cst_19 = arith.constant dense<0.000000e+00> : vector<2x32xf32>
    %17 = tpu.matmul %16, %10, %cst_19 {dimension_numbers = #tpu.dot_dimension_numbers<[1], [0], [0], [1], [0, 0, 1, 1], [], []>} : vector<2x32xbf16>, vector<32x32xbf16>, vector<2x32xf32> -> vector<2x32xf32>
    %18 = arith.truncf %17 : vector<2x32xf32> to vector<2x32xbf16>
    %cst_20 = arith.constant dense<0.000000e+00> : vector<2x32xf32>
    %19 = tpu.matmul %18, %11, %cst_20 {dimension_numbers = #tpu.dot_dimension_numbers<[1], [0], [0], [1], [0, 0, 1, 1], [], []>} : vector<2x32xbf16>, vector<32x32xbf16>, vector<2x32xf32> -> vector<2x32xf32>
    %20 = vector.shape_cast %9 : vector<8x32xf32> to vector<1x8x32xf32>
    %21 = vector.shape_cast %19 : vector<2x32xf32> to vector<2x1x32xf32>
    %22 = vector.broadcast %20 : vector<1x8x32xf32> to vector<2x8x32xf32>
    %23 = vector.broadcast %21 : vector<2x1x32xf32> to vector<2x8x32xf32>
    %24 = arith.addf %22, %23 : vector<2x8x32xf32>
    %25 = vector.shape_cast %24 : vector<2x8x32xf32> to vector<16x32xf32>
    %26 = arith.truncf %25 : vector<16x32xf32> to vector<16x32xbf16>
    %cst_21 = arith.constant dense<0.000000e+00> : vector<16x64xf32>
    %27 = tpu.matmul %26, %12, %cst_21 {dimension_numbers = #tpu.dot_dimension_numbers<[1], [0], [0], [1], [0, 0, 1, 1], [], []>} : vector<16x32xbf16>, vector<32x64xbf16>, vector<16x64xf32> -> vector<16x64xf32>
    %28 = vector.broadcast %13 : vector<1x64xf32> to vector<16x64xf32>
    %29 = arith.addf %27, %28 : vector<16x64xf32>
    %cst_22 = arith.constant 0.000000e+00 : f32
    %30 = vector.broadcast %cst_22 : f32 to vector<16x64xf32>
    %31 = arith.maximumf %29, %30 : vector<16x64xf32>
    %32 = arith.truncf %31 : vector<16x64xf32> to vector<16x64xbf16>
    %cst_23 = arith.constant dense<0.000000e+00> : vector<16x32xf32>
    %33 = tpu.matmul %32, %14, %cst_23 {dimension_numbers = #tpu.dot_dimension_numbers<[1], [0], [0], [1], [0, 0, 1, 1], [], []>} : vector<16x64xbf16>, vector<64x32xbf16>, vector<16x32xf32> -> vector<16x32xf32>
    %34 = vector.broadcast %15 : vector<1x32xf32> to vector<16x32xf32>
    %35 = arith.addf %33, %34 : vector<16x32xf32>
    %36 = arith.addf %25, %35 : vector<16x32xf32>
    %c0_24 = arith.constant 0 : index
    %c0_25 = arith.constant 0 : index
    %37 = vector.load %arg11[%c0_24, %c0_25] : memref<32x32xbf16, #tpu.memory_space<vmem>>, vector<32x32xbf16>
    %c0_26 = arith.constant 0 : index
    %c0_27 = arith.constant 0 : index
    %38 = vector.load %arg12[%c0_26, %c0_27] : memref<32x32xbf16, #tpu.memory_space<vmem>>, vector<32x32xbf16>
    %c0_28 = arith.constant 0 : index
    %c0_29 = arith.constant 0 : index
    %39 = vector.load %arg13[%c0_28, %c0_29] : memref<32x64xbf16, #tpu.memory_space<vmem>>, vector<32x64xbf16>
    %c0_30 = arith.constant 0 : index
    %c0_31 = arith.constant 0 : index
    %40 = vector.load %arg14[%c0_30, %c0_31] : memref<1x64xf32, #tpu.memory_space<vmem>>, vector<1x64xf32>
    %c0_32 = arith.constant 0 : index
    %c0_33 = arith.constant 0 : index
    %41 = vector.load %arg15[%c0_32, %c0_33] : memref<64x32xbf16, #tpu.memory_space<vmem>>, vector<64x32xbf16>
    %c0_34 = arith.constant 0 : index
    %c0_35 = arith.constant 0 : index
    %42 = vector.load %arg16[%c0_34, %c0_35] : memref<1x32xf32, #tpu.memory_space<vmem>>, vector<1x32xf32>
    %43 = arith.truncf %8 : vector<2x32xf32> to vector<2x32xbf16>
    %cst_36 = arith.constant dense<0.000000e+00> : vector<2x32xf32>
    %44 = tpu.matmul %43, %37, %cst_36 {dimension_numbers = #tpu.dot_dimension_numbers<[1], [0], [0], [1], [0, 0, 1, 1], [], []>} : vector<2x32xbf16>, vector<32x32xbf16>, vector<2x32xf32> -> vector<2x32xf32>
    %45 = arith.truncf %44 : vector<2x32xf32> to vector<2x32xbf16>
    %cst_37 = arith.constant dense<0.000000e+00> : vector<2x32xf32>
    %46 = tpu.matmul %45, %38, %cst_37 {dimension_numbers = #tpu.dot_dimension_numbers<[1], [0], [0], [1], [0, 0, 1, 1], [], []>} : vector<2x32xbf16>, vector<32x32xbf16>, vector<2x32xf32> -> vector<2x32xf32>
    %47 = vector.shape_cast %9 : vector<8x32xf32> to vector<1x8x32xf32>
    %48 = vector.shape_cast %46 : vector<2x32xf32> to vector<2x1x32xf32>
    %49 = vector.broadcast %47 : vector<1x8x32xf32> to vector<2x8x32xf32>
    %50 = vector.broadcast %48 : vector<2x1x32xf32> to vector<2x8x32xf32>
    %51 = arith.addf %49, %50 : vector<2x8x32xf32>
    %52 = vector.shape_cast %51 : vector<2x8x32xf32> to vector<16x32xf32>
    %53 = arith.truncf %52 : vector<16x32xf32> to vector<16x32xbf16>
    %cst_38 = arith.constant dense<0.000000e+00> : vector<16x64xf32>
    %54 = tpu.matmul %53, %39, %cst_38 {dimension_numbers = #tpu.dot_dimension_numbers<[1], [0], [0], [1], [0, 0, 1, 1], [], []>} : vector<16x32xbf16>, vector<32x64xbf16>, vector<16x64xf32> -> vector<16x64xf32>
    %55 = vector.broadcast %40 : vector<1x64xf32> to vector<16x64xf32>
    %56 = arith.addf %54, %55 : vector<16x64xf32>
    %cst_39 = arith.constant 0.000000e+00 : f32
    %57 = vector.broadcast %cst_39 : f32 to vector<16x64xf32>
    %58 = arith.maximumf %56, %57 : vector<16x64xf32>
    %59 = arith.truncf %58 : vector<16x64xf32> to vector<16x64xbf16>
    %cst_40 = arith.constant dense<0.000000e+00> : vector<16x32xf32>
    %60 = tpu.matmul %59, %41, %cst_40 {dimension_numbers = #tpu.dot_dimension_numbers<[1], [0], [0], [1], [0, 0, 1, 1], [], []>} : vector<16x64xbf16>, vector<64x32xbf16>, vector<16x32xf32> -> vector<16x32xf32>
    %61 = vector.broadcast %42 : vector<1x32xf32> to vector<16x32xf32>
    %62 = arith.addf %60, %61 : vector<16x32xf32>
    %63 = arith.addf %52, %62 : vector<16x32xf32>
    %64 = arith.subf %63, %36 : vector<16x32xf32>
    %65 = vector.shape_cast %64 : vector<16x32xf32> to vector<2x8x32xf32>
    %cst_41 = arith.constant dense<0.000000e+00> : vector<2x32xf32>
    %66 = vector.multi_reduction <add>, %65, %cst_41 [1] : vector<2x8x32xf32> to vector<2x32xf32>
    %cst_42 = arith.constant 1.250000e-01 : f32
    %67 = vector.broadcast %cst_42 : f32 to vector<2x32xf32>
    %68 = arith.mulf %66, %67 : vector<2x32xf32>
    %69 = arith.addf %6, %68 : vector<2x32xf32>
    %70 = arith.truncf %69 : vector<2x32xf32> to vector<2x32xbf16>
    %c0_43 = arith.constant 0 : index
    %c0_44 = arith.constant 0 : index
    %71 = vector.load %arg17[%c0_43, %c0_44] : memref<32x32xbf16, #tpu.memory_space<vmem>>, vector<32x32xbf16>
    %cst_45 = arith.constant dense<0.000000e+00> : vector<2x32xf32>
    %72 = tpu.matmul %70, %71, %cst_45 {dimension_numbers = #tpu.dot_dimension_numbers<[1], [0], [0], [1], [0, 0, 1, 1], [], []>} : vector<2x32xbf16>, vector<32x32xbf16>, vector<2x32xf32> -> vector<2x32xf32>
    %c0_46 = arith.constant 0 : index
    %c0_47 = arith.constant 0 : index
    %73 = vector.load %arg18[%c0_46, %c0_47] : memref<1x32xf32, #tpu.memory_space<vmem>>, vector<1x32xf32>
    %74 = vector.broadcast %73 : vector<1x32xf32> to vector<2x32xf32>
    %75 = arith.addf %72, %74 : vector<2x32xf32>
    %76 = vector.extract_strided_slice %75 {offsets = [0, 0], sizes = [2, 16], strides = [1, 1]} : vector<2x32xf32> to vector<2x16xf32>
    %77 = vector.extract_strided_slice %75 {offsets = [0, 16], sizes = [2, 16], strides = [1, 1]} : vector<2x32xf32> to vector<2x16xf32>
    %c0_48 = arith.constant 0 : index
    %c0_49 = arith.constant 0 : index
    %78 = vector.load %arg19[%c0_48, %c0_49] : memref<128x16xbf16, #tpu.memory_space<vmem>>, vector<128x16xbf16>
    %79 = arith.extf %78 : vector<128x16xbf16> to vector<128x16xf32>
    %80 = vector.shape_cast %79 : vector<128x16xf32> to vector<2x64x16xf32>
    %81 = vector.shape_cast %76 : vector<2x16xf32> to vector<2x1x16xf32>
    %cst_50 = arith.constant 1.000000e+00 : f32
    %82 = vector.broadcast %cst_50 : f32 to vector<2x1x16xf32>
    %83 = arith.addf %82, %81 : vector<2x1x16xf32>
    %84 = vector.broadcast %83 : vector<2x1x16xf32> to vector<2x64x16xf32>
    %85 = arith.mulf %80, %84 : vector<2x64x16xf32>
    %86 = vector.shape_cast %77 : vector<2x16xf32> to vector<2x1x16xf32>
    %87 = vector.broadcast %86 : vector<2x1x16xf32> to vector<2x64x16xf32>
    %88 = arith.addf %85, %87 : vector<2x64x16xf32>
    %cst_51 = arith.constant 0.000000e+00 : f32
    %89 = vector.broadcast %cst_51 : f32 to vector<2x64x16xf32>
    %90 = arith.cmpf oge, %88, %89 : vector<2x64x16xf32>
    %cst_52 = arith.constant 2.000000e-01 : f32
    %91 = vector.broadcast %cst_52 : f32 to vector<2x64x16xf32>
    %92 = arith.mulf %91, %88 : vector<2x64x16xf32>
    %93 = arith.select %90, %88, %92 : vector<2x64x16xi1>, vector<2x64x16xf32>
    %94 = vector.shape_cast %93 : vector<2x64x16xf32> to vector<128x16xf32>
    %95 = arith.truncf %94 : vector<128x16xf32> to vector<128x16xbf16>
    %c0_53 = arith.constant 0 : index
    %c0_54 = arith.constant 0 : index
    %96 = vector.load %arg20[%c0_53, %c0_54] : memref<16x128xbf16, #tpu.memory_space<vmem>>, vector<16x128xbf16>
    %cst_55 = arith.constant dense<0.000000e+00> : vector<128x128xf32>
    %97 = tpu.matmul %95, %96, %cst_55 {dimension_numbers = #tpu.dot_dimension_numbers<[1], [0], [0], [1], [0, 0, 1, 1], [], []>} : vector<128x16xbf16>, vector<16x128xbf16>, vector<128x128xf32> -> vector<128x128xf32>
    %c0_56 = arith.constant 0 : index
    %c0_57 = arith.constant 0 : index
    %98 = vector.load %arg21[%c0_56, %c0_57] : memref<1x128xf32, #tpu.memory_space<vmem>>, vector<1x128xf32>
    %99 = vector.broadcast %98 : vector<1x128xf32> to vector<128x128xf32>
    %100 = arith.addf %97, %99 : vector<128x128xf32>
    %c0_58 = arith.constant 0 : index
    %c0_59 = arith.constant 0 : index
    %101 = vector.load %arg22[%c0_58, %c0_59] : memref<128x128xf32, #tpu.memory_space<vmem>>, vector<128x128xf32>
    tpu.vector_store %arg22[%c0_58, %c0_59], %100 {strides = array<i32>} : memref<128x128xf32, #tpu.memory_space<vmem>>, vector<128x128xf32>,
    return
  }
  func.func @transform_0(%arg0: i32) -> (i32, i32) {
    %c0_i32 = arith.constant 0 : i32
    %c0_i32_0 = arith.constant 0 : i32
    %c0_i32_1 = arith.constant 0 : i32
    return %c0_i32, %c0_i32_0 : i32, i32
  }
  func.func @transform_1(%arg0: i32) -> (i32, i32) {
    %c0_i32 = arith.constant 0 : i32
    %c0_i32_0 = arith.constant 0 : i32
    %c0_i32_1 = arith.constant 0 : i32
    return %c0_i32, %c0_i32_0 : i32, i32
  }
  func.func @transform_2(%arg0: i32) -> (i32, i32) {
    %c0_i32 = arith.constant 0 : i32
    %c0_i32_0 = arith.constant 0 : i32
    %c0_i32_1 = arith.constant 0 : i32
    return %c0_i32, %c0_i32_0 : i32, i32
  }
  func.func @transform_3(%arg0: i32) -> (i32, i32) {
    %c0_i32 = arith.constant 0 : i32
    %c0_i32_0 = arith.constant 0 : i32
    %c0_i32_1 = arith.constant 0 : i32
    return %c0_i32, %c0_i32_0 : i32, i32
  }
  func.func @transform_4(%arg0: i32) -> (i32, i32) {
    %c0_i32 = arith.constant 0 : i32
    %c0_i32_0 = arith.constant 0 : i32
    %c0_i32_1 = arith.constant 0 : i32
    return %c0_i32, %c0_i32_0 : i32, i32
  }
  func.func @transform_5(%arg0: i32) -> (i32, i32) {
    %c0_i32 = arith.constant 0 : i32
    %c0_i32_0 = arith.constant 0 : i32
    %c0_i32_1 = arith.constant 0 : i32
    return %c0_i32, %c0_i32_0 : i32, i32
  }
  func.func @transform_6(%arg0: i32) -> (i32, i32) {
    %c0_i32 = arith.constant 0 : i32
    %c0_i32_0 = arith.constant 0 : i32
    %c0_i32_1 = arith.constant 0 : i32
    return %c0_i32, %c0_i32_0 : i32, i32
  }
  func.func @transform_7(%arg0: i32) -> (i32, i32) {
    %c0_i32 = arith.constant 0 : i32
    %c0_i32_0 = arith.constant 0 : i32
    %c0_i32_1 = arith.constant 0 : i32
    return %c0_i32, %c0_i32_0 : i32, i32
  }
  func.func @transform_8(%arg0: i32) -> (i32, i32) {
    %c0_i32 = arith.constant 0 : i32
    %c0_i32_0 = arith.constant 0 : i32
    %c0_i32_1 = arith.constant 0 : i32
    return %c0_i32, %c0_i32_0 : i32, i32
  }
  func.func @transform_9(%arg0: i32) -> (i32, i32) {
    %c0_i32 = arith.constant 0 : i32
    %c0_i32_0 = arith.constant 0 : i32
    %c0_i32_1 = arith.constant 0 : i32
    return %c0_i32, %c0_i32_0 : i32, i32
  }
  func.func @transform_10(%arg0: i32) -> (i32, i32) {
    %c0_i32 = arith.constant 0 : i32
    %c0_i32_0 = arith.constant 0 : i32
    %c0_i32_1 = arith.constant 0 : i32
    return %c0_i32, %c0_i32_0 : i32, i32
  }
  func.func @transform_11(%arg0: i32) -> (i32, i32) {
    %c0_i32 = arith.constant 0 : i32
    %c0_i32_0 = arith.constant 0 : i32
    %c0_i32_1 = arith.constant 0 : i32
    return %c0_i32, %c0_i32_0 : i32, i32
  }
  func.func @transform_12(%arg0: i32) -> (i32, i32) {
    %c0_i32 = arith.constant 0 : i32
    %c0_i32_0 = arith.constant 0 : i32
    %c0_i32_1 = arith.constant 0 : i32
    return %c0_i32, %c0_i32_0 : i32, i32
  }
  func.func @transform_13(%arg0: i32) -> (i32, i32) {
    %c0_i32 = arith.constant 0 : i32
    %c0_i32_0 = arith.constant 0 : i32
    %c0_i32_1 = arith.constant 0 : i32
    return %c0_i32, %c0_i32_0 : i32, i32
  }
  func.func @transform_14(%arg0: i32) -> (i32, i32) {
    %c0_i32 = arith.constant 0 : i32
    %c0_i32_0 = arith.constant 0 : i32
    %c0_i32_1 = arith.constant 0 : i32
    return %c0_i32, %c0_i32_0 : i32, i32
  }
  func.func @transform_15(%arg0: i32) -> (i32, i32) {
    %c0_i32 = arith.constant 0 : i32
    %c0_i32_0 = arith.constant 0 : i32
    %c0_i32_1 = arith.constant 0 : i32
    return %c0_i32, %c0_i32_0 : i32, i32
  }
  func.func @transform_16(%arg0: i32) -> (i32, i32) {
    %c0_i32 = arith.constant 0 : i32
    %c0_i32_0 = arith.constant 0 : i32
    %c0_i32_1 = arith.constant 0 : i32
    return %c0_i32, %c0_i32_0 : i32, i32
  }
  func.func @transform_17(%arg0: i32) -> (i32, i32) {
    %c0_i32 = arith.constant 0 : i32
    %c0_i32_0 = arith.constant 0 : i32
    %c0_i32_1 = arith.constant 0 : i32
    return %c0_i32, %c0_i32_0 : i32, i32
  }
  func.func @transform_18(%arg0: i32) -> (i32, i32) {
    %c0_i32 = arith.constant 0 : i32
    %c0_i32_0 = arith.constant 0 : i32
    %c0_i32_1 = arith.constant 0 : i32
    return %c0_i32, %c0_i32_0 : i32, i32
  }
  func.func @transform_19(%arg0: i32) -> (i32, i32) {
    %c0_i32 = arith.constant 0 : i32
    %c0_i32_0 = arith.constant 0 : i32
    %c0_i32_1 = arith.constant 0 : i32
    return %c0_i32, %c0_i32_0 : i32, i32
  }
  func.func @transform_20(%arg0: i32) -> (i32, i32) {
    %c0_i32 = arith.constant 0 : i32
    %c0_i32_0 = arith.constant 0 : i32
    %c0_i32_1 = arith.constant 0 : i32
    return %c0_i32, %c0_i32_0 : i32, i32
  }
  func.func @transform_21(%arg0: i32) -> (i32, i32) {
    %c0_i32 = arith.constant 0 : i32
    %c0_i32_0 = arith.constant 0 : i32
    %c0_i32_1 = arith.constant 0 : i32
    return %c0_i32, %c0_i32_0 : i32, i32
  }
}

</mosaic_0001>

<bundles_post_ra>
// kernel: generator_forward.2
= control target key start
LH: loop header
LB: loop body
LE: loop exit
PB: predicated region body
PF: predicated region fallthrough
CT: control target
= control target key end

     0   :  { %vm198_vm0 = vcmask 1044480   ;;  %vm199_vm1 = vcmask 1045504   ;;  %vm149_vm2 = vcmask 220160   ;;  %v897_v1 = vmov 65535   ;;  %s1079_s1 = inlined_call_operand.vmem [shape: bf16[27,128], index: 1, kind: input, shape index: {}]   ;;  %s1080_s0 = inlined_call_operand.vmem [shape: bf16[256,27], index: 0, kind: input, shape index: {}]   ;;  %s1081_s2 = inlined_call_operand.vmem [shape: f32[1,128], index: 2, kind: input, shape index: {}]   ;;  %s1082_s3 = inlined_call_operand.vmem [shape: bf16[256,128], index: 3, kind: output, shape index: {}]  }
   0x1   :  { %v879_v0 = vld [vmem:[%s1079_s1] sm:$0xff]   ;;  %v200_v2 = vsel %vm198_vm0, 4294967295, %v897_v1  ;;  %v880_v3 = vld [vmem:[%s1079_s1 + $0x8] sm:$0x3f]   ;;  %v885_v10 = vld [vmem:[%s1080_s0 + $0x10] sm:$0xff]  }
   0x2   :  { %838 = vmatprep.subr.bf16.mxu0 %v879_v0  ;;  %874 = vmatprep.subr.bf16.mxu1 %v879_v0  ;;  %v201_v4 = vsel %vm199_vm1, %v200_v2, 0  ;;  %v881_v5 = vld [vmem:[%s1080_s0] sm:$0xff]   ;;  %v883_v8 = vld [vmem:[%s1080_s0 + $0x8] sm:$0xff]   ;;  %v886_v11 = vld [vmem:[%s1080_s0 + $0x50] sm:$0xff]  }
   0x3   :  { %839 = vmatpush3.bf16.msra.mxu0 %v879_v0  ;;  %876 = vmatpush3.bf16.msra.mxu1 %v879_v0  ;;  %v203_v6 = vand.u32 %v880_v3, %v201_v4  ;;  %v882_v7 = vld [vmem:[%s1080_s0 + $0x40] sm:$0xff]   ;;  %v884_v9 = vld [vmem:[%s1080_s0 + $0x48] sm:$0xff]   ;;  %v887_v12 = vld [vmem:[%s1080_s0 + $0x18] sm:$0xff]  }
   0x4   :  { %842 = vmatprep.mubr.msk.bf16.mxu0 %vm149_vm2, %v881_v5  ;;  %858 = vmatprep.mubr.msk.bf16.mxu1 %vm149_vm2, %v882_v7  ;;  %v888_v13 = vld [vmem:[%s1080_s0 + $0x58] sm:$0xff]   ;;  %v889_v14 = vld [vmem:[%s1080_s0 + $0x20] sm:$0xff]   ;;  %v891_v16 = vld [vmem:[%s1080_s0 + $0x28] sm:$0xff]  }
   0x5   :  { %840 = vmatprep.subr.bf16.mxu0 %v203_v6  ;;  %875 = vmatprep.subr.bf16.mxu1 %v203_v6  ;;  %v890_v15 = vld [vmem:[%s1080_s0 + $0x60] sm:$0xff]   ;;  %v892_v17 = vld [vmem:[%s1080_s0 + $0x68] sm:$0xff]   ;;  %v893_v18 = vld [vmem:[%s1080_s0 + $0x30] sm:$0xff]  }
   0x6   :  { %v894_v19 = vld [vmem:[%s1080_s0 + $0x70] sm:$0xff]   ;;  %v895_v20 = vld [vmem:[%s1080_s0 + $0x38] sm:$0xff]   ;;  %v991_v22 = vld [vmem:[%s1081_s2] ss:$0 sm:$0xff] }
   0x7   :  { %841 = vmatpush3.bf16.msra.mxu0 %v203_v6  ;;  %877 = vmatpush3.bf16.msra.mxu1 %v203_v6  ;;  %v896_v21 = vld [vmem:[%s1080_s0 + $0x78] sm:$0xff]  }
   0xa   :  { %843 = vmatmul.mubr.msk.bf16.vlgmr.msra.gmra.mrb[0].mxu0 %vm149_vm2, %v883_v8  ;;  %859 = vmatmul.mubr.msk.bf16.vlgmr.msra.gmra.mrb[0].mxu1 %vm149_vm2, %v884_v9 }
   0xb   :  { %846 = vmatprep.mubr.msk.bf16.mxu0 %vm149_vm2, %v885_v10  ;;  %862 = vmatprep.mubr.msk.bf16.mxu1 %vm149_vm2, %v886_v11 }
  0x12   :  { %847 = vmatmul.mubr.msk.bf16.gmra.mrb[4].mxu0 %vm149_vm2, %v887_v12  ;;  %863 = vmatmul.mubr.msk.bf16.gmra.mrb[4].mxu1 %vm149_vm2, %v888_v13 }
  0x13   :  { %850 = vmatprep.mubr.msk.bf16.mxu0 %vm149_vm2, %v889_v14  ;;  %866 = vmatprep.mubr.msk.bf16.mxu1 %vm149_vm2, %v890_v15 }
  0x1a   :  { %851 = vmatmul.mubr.msk.bf16.gmra.mrb[8].mxu0 %vm149_vm2, %v891_v16  ;;  %867 = vmatmul.mubr.msk.bf16.gmra.mrb[8].mxu1 %vm149_vm2, %v892_v17 }
  0x1b   :  { %854 = vmatprep.mubr.msk.bf16.mxu0 %vm149_vm2, %v893_v18  ;;  %870 = vmatprep.mubr.msk.bf16.mxu1 %vm149_vm2, %v894_v19 }
  0x22   :  { %855 = vmatmul.mubr.msk.bf16.gmra.mrb[12].mxu0 %vm149_vm2, %v895_v20  ;;  %871 = vmatmul.mubr.msk.bf16.gmra.mrb[12].mxu1 %vm149_vm2, %v896_v21 }
  0xdd   :  { %v844_v23 = vpop.f32.mrb[0].mxu0  ;;  %v860_v24 = vpop.f32.mrb[0].mxu1 }
  0xde   :  { %v248_v25 = vadd.f32 %v844_v23, %v991_v22  ;;  %v312_v26 = vadd.f32 %v860_v24, %v991_v22  ;;  %v239_v27 = vpop.f32.mrb[1].mxu0  ;;  %v303_v28 = vpop.f32.mrb[1].mxu1 }
  0xdf   :  { %v240_v29 = vadd.f32 %v991_v22, %v239_v27  ;;  %v304_v30 = vadd.f32 %v991_v22, %v303_v28  ;;  %v845_v31 = vpop.f32.mrb[2].mxu0  ;;  %v861_v32 = vpop.f32.mrb[2].mxu1 }
  0xe0   :  { %vm368_vm3 = vcmp.ge.f32.partialorder %v248_v25, 0.0  ;;  %v400_v33 = vmul.f32 0.2, %v248_v25  ;;  %vm384_vm4 = vcmp.ge.f32.partialorder %v312_v26, 0.0  ;;  %v416_v34 = vmul.f32 0.2, %v312_v26 }
  0xe1   :  { %vm366_vm5 = vcmp.ge.f32.partialorder %v240_v29, 0.0  ;;  %v398_v35 = vmul.f32 0.2, %v240_v29  ;;  %vm382_vm6 = vcmp.ge.f32.partialorder %v304_v30, 0.0  ;;  %v414_v36 = vmul.f32 0.2, %v304_v30 }
  0xe2   :  { %v251_v37 = vadd.f32 %v845_v31, %v991_v22  ;;  %v315_v38 = vadd.f32 %v861_v32, %v991_v22  ;;  %v242_v39 = vpop.f32.mrb[3].mxu0  ;;  %v306_v40 = vpop.f32.mrb[3].mxu1  ;;  %v432_v41 = vsel %vm368_vm3, %v248_v25, %v400_v33  ;;  %v448_v42 = vsel %vm384_vm4, %v312_v26, %v416_v34 }
  0xe3   :  { %v243_v43 = vadd.f32 %v991_v22, %v242_v39  ;;  %v307_v44 = vadd.f32 %v991_v22, %v306_v40  ;;  %v430_v49 = vsel %vm366_vm5, %v240_v29, %v398_v35  ;;  %v446_v50 = vsel %vm382_vm6, %v304_v30, %v414_v36 }
  0xe4   :  { %vm369_vm7 = vcmp.ge.f32.partialorder %v251_v37, 0.0  ;;  %v401_v45 = vmul.f32 0.2, %v251_v37  ;;  %vm385_vm8 = vcmp.ge.f32.partialorder %v315_v38, 0.0  ;;  %v417_v46 = vmul.f32 0.2, %v315_v38 }
  0xe5   :  { %vm367_vm9 = vcmp.ge.f32.partialorder %v243_v43, 0.0  ;;  %v399_v47 = vmul.f32 0.2, %v243_v43  ;;  %vm383_vm10 = vcmp.ge.f32.partialorder %v307_v44, 0.0  ;;  %v415_v48 = vmul.f32 0.2, %v307_v44 }
  0xe6   :  { %v433_v51 = vsel %vm369_vm7, %v251_v37, %v401_v45  ;;  %v449_v52 = vsel %vm385_vm8, %v315_v38, %v417_v46  ;;  %v848_v53 = vpop.f32.mrb[4].mxu0  ;;  %v864_v54 = vpop.f32.mrb[4].mxu1 }
  0xe7   :  { %v733_v55 = vpack.c.bf16 %v433_v51, %v432_v41  ;;  %v773_v56 = vpack.c.bf16 %v449_v52, %v448_v42  ;;  %v431_v57 = vsel %vm367_vm9, %v243_v43, %v399_v47  ;;  %v447_v58 = vsel %vm383_vm10, %v307_v44, %v415_v48  ;;  %v255_v59 = vpop.f32.mrb[5].mxu0  ;;  %v319_v60 = vpop.f32.mrb[5].mxu1 }
  0xe8   :  { %v728_v61 = vpack.c.bf16 %v431_v57, %v430_v49  ;;  %v768_v62 = vpack.c.bf16 %v447_v58, %v446_v50  ;;  %v264_v63 = vadd.f32 %v848_v53, %v991_v22  ;;  %v328_v0 = vadd.f32 %v864_v54, %v991_v22  ;;  %v849_v1 = vpop.f32.mrb[6].mxu0  ;;  %v865_v2 = vpop.f32.mrb[6].mxu1 }
  0xe9   :  { %805 = vst [vmem:[%s1082_s3 + $0x8] sm:$0xff] %v733_v55   ;;  %813 = vst [vmem:[%s1082_s3 + $0x48] sm:$0xff] %v773_v56   ;;  %v256_v3 = vadd.f32 %v991_v22, %v255_v59  ;;  %v320_v4 = vadd.f32 %v991_v22, %v319_v60  ;;  %v267_v5 = vadd.f32 %v849_v1, %v991_v22  ;;  %v258_v7 = vpop.f32.mrb[7].mxu0  ;;  %v322_v8 = vpop.f32.mrb[7].mxu1 }
  0xea   :  { %v331_v6 = vadd.f32 %v865_v2, %v991_v22  ;;  %729 = vst [vmem:[%s1082_s3] sm:$0xff] %v728_v61   ;;  %812 = vst [vmem:[%s1082_s3 + $0x40] sm:$0xff] %v768_v62   ;;  %vm372_vm11 = vcmp.ge.f32.partialorder %v264_v63, 0.0  ;;  %v404_v9 = vmul.f32 0.2, %v264_v63  ;;  %vm388_vm12 = vcmp.ge.f32.partialorder %v328_v0, 0.0 }
  0xeb   :  { %v420_v10 = vmul.f32 0.2, %v328_v0  ;;  %vm370_vm13 = vcmp.ge.f32.partialorder %v256_v3, 0.0  ;;  %v402_v11 = vmul.f32 0.2, %v256_v3  ;;  %vm386_vm14 = vcmp.ge.f32.partialorder %v320_v4, 0.0 }
  0xec   :  { %v436_v12 = vsel %vm372_vm11, %v264_v63, %v404_v9  ;;  %v418_v13 = vmul.f32 0.2, %v320_v4  ;;  %vm373_vm15 = vcmp.ge.f32.partialorder %v267_v5, 0.0  ;;  %v405_v14 = vmul.f32 0.2, %v267_v5 }
  0xed   :  { %v452_v15 = vsel %vm388_vm12, %v328_v0, %v420_v10  ;;  %v434_v16 = vsel %vm370_vm13, %v256_v3, %v402_v11  ;;  %vm389_vm0 = vcmp.ge.f32.partialorder %v331_v6, 0.0  ;;  %v421_v17 = vmul.f32 0.2, %v331_v6  ;;  %v852_v18 = vpop.f32.mrb[8].mxu0  ;;  %v868_v19 = vpop.f32.mrb[8].mxu1 }
  0xee   :  { %v437_v20 = vsel %vm373_vm15, %v267_v5, %v405_v14  ;;  %v259_v21 = vadd.f32 %v991_v22, %v258_v7  ;;  %v323_v23 = vadd.f32 %v991_v22, %v322_v8  ;;  %v280_v24 = vadd.f32 %v852_v18, %v991_v22  ;;  %v271_v25 = vpop.f32.mrb[9].mxu0  ;;  %v335_v26 = vpop.f32.mrb[9].mxu1 }
  0xef   :  { %v743_v27 = vpack.c.bf16 %v437_v20, %v436_v12  ;;  %v453_v28 = vsel %vm389_vm0, %v331_v6, %v421_v17  ;;  %v344_v29 = vadd.f32 %v868_v19, %v991_v22  ;;  %v272_v30 = vadd.f32 %v991_v22, %v271_v25  ;;  %v853_v31 = vpop.f32.mrb[10].mxu0  ;;  %v869_v32 = vpop.f32.mrb[10].mxu1 }
  0xf0   :  { %v783_v33 = vpack.c.bf16 %v453_v28, %v452_v15  ;;  %vm371_vm1 = vcmp.ge.f32.partialorder %v259_v21, 0.0  ;;  %v403_v34 = vmul.f32 0.2, %v259_v21  ;;  %vm387_vm2 = vcmp.ge.f32.partialorder %v323_v23, 0.0  ;;  %v274_v35 = vpop.f32.mrb[11].mxu0  ;;  %v338_v36 = vpop.f32.mrb[11].mxu1 }
  0xf1   :  { %807 = vst [vmem:[%s1082_s3 + $0x18] sm:$0xff] %v743_v27   ;;  %v419_v37 = vmul.f32 0.2, %v323_v23  ;;  %vm376_vm3 = vcmp.ge.f32.partialorder %v280_v24, 0.0  ;;  %v408_v38 = vmul.f32 0.2, %v280_v24  ;;  %v450_v39 = vsel %vm386_vm14, %v320_v4, %v418_v13 }
  0xf2   :  { %vm392_vm4 = vcmp.ge.f32.partialorder %v344_v29, 0.0  ;;  %815 = vst [vmem:[%s1082_s3 + $0x58] sm:$0xff] %v783_v33   ;;  %v435_v40 = vsel %vm371_vm1, %v259_v21, %v403_v34  ;;  %v424_v41 = vmul.f32 0.2, %v344_v29  ;;  %vm374_vm5 = vcmp.ge.f32.partialorder %v272_v30, 0.0 }
  0xf3   :  { %v738_v42 = vpack.c.bf16 %v435_v40, %v434_v16  ;;  %v451_v43 = vsel %vm387_vm2, %v323_v23, %v419_v37  ;;  %v406_v44 = vmul.f32 0.2, %v272_v30  ;;  %v336_v45 = vadd.f32 %v991_v22, %v335_v26 }
  0xf4   :  { %v778_v46 = vpack.c.bf16 %v451_v43, %v450_v39  ;;  %v440_v47 = vsel %vm376_vm3, %v280_v24, %v408_v38  ;;  %v456_v48 = vsel %vm392_vm4, %v344_v29, %v424_v41  ;;  %v283_v49 = vadd.f32 %v853_v31, %v991_v22 }
  0xf5   :  { %806 = vst [vmem:[%s1082_s3 + $0x10] sm:$0xff] %v738_v42   ;;  %vm390_vm6 = vcmp.ge.f32.partialorder %v336_v45, 0.0  ;;  %v422_v50 = vmul.f32 0.2, %v336_v45  ;;  %v347_v51 = vadd.f32 %v869_v32, %v991_v22  ;;  %v275_v52 = vadd.f32 %v991_v22, %v274_v35  ;;  %v856_v53 = vpop.f32.mrb[12].mxu0  ;;  %v872_v54 = vpop.f32.mrb[12].mxu1 }
  0xf6   :  { %814 = vst [vmem:[%s1082_s3 + $0x50] sm:$0xff] %v778_v46   ;;  %vm377_vm7 = vcmp.ge.f32.partialorder %v283_v49, 0.0  ;;  %v409_v55 = vmul.f32 0.2, %v283_v49  ;;  %v339_v56 = vadd.f32 %v991_v22, %v338_v36  ;;  %v296_v57 = vadd.f32 %v856_v53, %v991_v22  ;;  %v287_v58 = vpop.f32.mrb[13].mxu0  ;;  %v351_v59 = vpop.f32.mrb[13].mxu1 }
  0xf7   :  { %v438_v60 = vsel %vm374_vm5, %v272_v30, %v406_v44  ;;  %vm393_vm8 = vcmp.ge.f32.partialorder %v347_v51, 0.0  ;;  %v425_v61 = vmul.f32 0.2, %v347_v51  ;;  %vm375_vm9 = vcmp.ge.f32.partialorder %v275_v52, 0.0  ;;  %v857_v62 = vpop.f32.mrb[14].mxu0  ;;  %v873_v63 = vpop.f32.mrb[14].mxu1 }
  0xf8   :  { %v441_v0 = vsel %vm377_vm7, %v283_v49, %v409_v55  ;;  %v407_v1 = vmul.f32 0.2, %v275_v52  ;;  %vm391_vm10 = vcmp.ge.f32.partialorder %v339_v56, 0.0  ;;  %v423_v2 = vmul.f32 0.2, %v339_v56  ;;  %v290_v3 = vpop.f32.mrb[15].mxu0 }
  0xf9   :  { %v454_v4 = vsel %vm390_vm6, %v336_v45, %v422_v50  ;;  %v753_v5 = vpack.c.bf16 %v441_v0, %v440_v47  ;;  %v457_v6 = vsel %vm393_vm8, %v347_v51, %v425_v61  ;;  %v412_v7 = vmul.f32 0.2, %v296_v57  ;;  %v354_v8 = vpop.f32.mrb[15].mxu1 }
  0xfa   :  { %v793_v9 = vpack.c.bf16 %v457_v6, %v456_v48  ;;  %v439_v10 = vsel %vm375_vm9, %v275_v52, %v407_v1  ;;  %v455_v11 = vsel %vm391_vm10, %v339_v56, %v423_v2  ;;  %v360_v12 = vadd.f32 %v872_v54, %v991_v22 }
  0xfb   :  { %809 = vst [vmem:[%s1082_s3 + $0x28] sm:$0xff] %v753_v5   ;;  %v748_v13 = vpack.c.bf16 %v439_v10, %v438_v60  ;;  %v788_v14 = vpack.c.bf16 %v455_v11, %v454_v4  ;;  %vm380_vm11 = vcmp.ge.f32.partialorder %v296_v57, 0.0  ;;  %v288_v15 = vadd.f32 %v991_v22, %v287_v58 }
  0xfc   :  { %817 = vst [vmem:[%s1082_s3 + $0x68] sm:$0xff] %v793_v9   ;;  %vm396_vm12 = vcmp.ge.f32.partialorder %v360_v12, 0.0  ;;  %v428_v16 = vmul.f32 0.2, %v360_v12  ;;  %v352_v17 = vadd.f32 %v991_v22, %v351_v59  ;;  %v299_v18 = vadd.f32 %v857_v62, %v991_v22 }
  0xfd   :  { %808 = vst [vmem:[%s1082_s3 + $0x20] sm:$0xff] %v748_v13   ;;  %816 = vst [vmem:[%s1082_s3 + $0x60] sm:$0xff] %v788_v14   ;;  %v410_v19 = vmul.f32 0.2, %v288_v15  ;;  %v363_v20 = vadd.f32 %v873_v63, %v991_v22  ;;  %v291_v21 = vadd.f32 %v991_v22, %v290_v3  ;;  %v444_v23 = vsel %vm380_vm11, %v296_v57, %v412_v7 }
  0xfe   :  { %vm378_vm13 = vcmp.ge.f32.partialorder %v288_v15, 0.0  ;;  %vm381_vm14 = vcmp.ge.f32.partialorder %v299_v18, 0.0  ;;  %v460_v24 = vsel %vm396_vm12, %v360_v12, %v428_v16  ;;  %v413_v25 = vmul.f32 0.2, %v299_v18 }
  0xff   :  { %vm397_vm15 = vcmp.ge.f32.partialorder %v363_v20, 0.0  ;;  %v429_v26 = vmul.f32 0.2, %v363_v20  ;;  %vm394_vm0 = vcmp.ge.f32.partialorder %v352_v17, 0.0  ;;  %vm379_vm1 = vcmp.ge.f32.partialorder %v291_v21, 0.0 }
 0x100   :  { %v411_v27 = vmul.f32 0.2, %v291_v21  ;;  %v355_v28 = vadd.f32 %v991_v22, %v354_v8  ;;  %v442_v29 = vsel %vm378_vm13, %v288_v15, %v410_v19  ;;  %v426_v30 = vmul.f32 0.2, %v352_v17 }
 0x101   :  { %v445_v31 = vsel %vm381_vm14, %v299_v18, %v413_v25  ;;  %v461_v32 = vsel %vm397_vm15, %v363_v20, %v429_v26 }
 0x102   :  { %v763_v33 = vpack.c.bf16 %v445_v31, %v444_v23  ;;  %v803_v34 = vpack.c.bf16 %v461_v32, %v460_v24  ;;  %v443_v35 = vsel %vm379_vm1, %v291_v21, %v411_v27  ;;  %vm395_vm2 = vcmp.ge.f32.partialorder %v355_v28, 0.0 }
 0x103   :  { %v758_v36 = vpack.c.bf16 %v443_v35, %v442_v29  ;;  %v427_v37 = vmul.f32 0.2, %v355_v28  ;;  %v458_v22 = vsel %vm394_vm0, %v352_v17, %v426_v30 }
 0x104   :  { %811 = vst [vmem:[%s1082_s3 + $0x38] sm:$0xff] %v763_v33   ;;  %819 = vst [vmem:[%s1082_s3 + $0x78] sm:$0xff] %v803_v34  }
 0x105   :  { %810 = vst [vmem:[%s1082_s3 + $0x30] sm:$0xff] %v758_v36   ;;  %v459_v38 = vsel %vm395_vm2, %v355_v28, %v427_v37 }
 0x106   :  { %v798_v39 = vpack.c.bf16 %v459_v38, %v458_v22 }
 0x108   :  { %818 = vst [vmem:[%s1082_s3 + $0x70] sm:$0xff] %v798_v39  }

// kernel: generator_forward.3
= control target key start
LH: loop header
LB: loop body
LE: loop exit
PB: predicated region body
PF: predicated region fallthrough
CT: control target
= control target key end

     0   :  { %vm2317_vm0 = vmmov 0   ;;  %s2318_s30 = smov 96   ;;  %vm820_vm1 = vcmask 261120   ;;  %vm1051_vm2 = vcmask 523264   ;;  %vm1431_vm3 = vcmask 1041409   ;;  %s2917_s1 = inlined_call_operand.vmem [shape: bf16[1024,64], index: 1, kind: input, shape index: {}]   ;;  %s2918_s0 = inlined_call_operand.vmem [shape: bf16[6,1024], index: 0, kind: input, shape index: {}]   ;;  %s2919_s4 = inlined_call_operand.vmem [shape: bf16[32,32], index: 4, kind: input, shape index: {}]   ;;  %s2920_s2 = inlined_call_operand.vmem [shape: f32[1,64], index: 2, kind: input, shape index: {}]   ;;  %s2921_s5 = inlined_call_operand.vmem [shape: bf16[32,32], index: 5, kind: input, shape index: {}]   ;;  %s2922_s6 = inlined_call_operand.vmem [shape: bf16[32,64], index: 6, kind: input, shape index: {}]   ;;  %s2923_s10 = inlined_call_operand.vmem [shape: bf16[32,32], index: 10, kind: input, shape index: {}]   ;;  %s2924_s8 = inlined_call_operand.vmem [shape: bf16[64,32], index: 8, kind: input, shape index: {}]   ;;  %s2925_s3 = inlined_call_operand.vmem [shape: f32[8,32], index: 3, kind: input, shape index: {}]   ;;  %s2926_s11 = inlined_call_operand.vmem [shape: bf16[32,32], index: 11, kind: input, shape index: {}]   ;;  %s2927_s7 = inlined_call_operand.vmem [shape: f32[1,64], index: 7, kind: input, shape index: {}]   ;;  %s2928_s12 = inlined_call_operand.vmem [shape: bf16[32,64], index: 12, kind: input, shape index: {}]   ;;  %s2929_s14 = inlined_call_operand.vmem [shape: bf16[64,32], index: 14, kind: input, shape index: {}]   ;;  %s2930_s13 = inlined_call_operand.vmem [shape: f32[1,64], index: 13, kind: input, shape index: {}]   ;;  %s2931_s16 = inlined_call_operand.vmem [shape: bf16[32,32], index: 16, kind: input, shape index: {}]   ;;  %s2932_s9 = inlined_call_operand.vmem [shape: f32[1,32], index: 9, kind: input, shape index: {}]   ;;  %s2933_s15 = inlined_call_operand.vmem [shape: f32[1,32], index: 15, kind: input, shape index: {}]   ;;  %s2934_s19 = inlined_call_operand.vmem [shape: bf16[16,128], index: 19, kind: input, shape index: {}]   ;;  %s2935_s17 = inlined_call_operand.vmem [shape: f32[1,32], index: 17, kind: input, shape index: {}]   ;;  %s2936_s18 = inlined_call_operand.vmem [shape: bf16[128,16], index: 18, kind: input, shape index: {}]   ;;  %s2937_s20 = inlined_call_operand.vmem [shape: f32[1,128], index: 20, kind: input, shape index: {}]   ;;  %s2938_s21 = inlined_call_operand.vmem [shape: f32[128,128], index: 21, kind: output, shape index: {}]  }
   0x1   :  { %2944 = sst [smem:[#allocation2_spill]] %s2917_s1  ;;  %vm1690_vm4 = vcmask 130048  }
   0x2   :  { %2945 = sst [smem:[#allocation3_spill]] %s2918_s0  ;;  %s2950_s26 = sld [smem:[#allocation2_spill]] }
   0x3   :  { %2946 = sst [smem:[#allocation4_spill]] %s2919_s4  ;;  %s2951_s22 = sld [smem:[#allocation3_spill]] }
   0x4   :  { %2947 = sst [smem:[#allocation5_spill]] %s2920_s2  ;;  %s2952_s2 = sld [smem:[#allocation4_spill]] }
   0x5   :  { %2948 = sst [smem:[#allocation6_spill]] %s2921_s5  ;;  %s2953_s5 = sld [smem:[#allocation5_spill]] }
   0x6   :  { %2949 = sst [smem:[#allocation7_spill]] %s2922_s6  ;;  %s2954_s0 = sld [smem:[#allocation6_spill]] }
   0x7   :  { %s2955_s27 = sld [smem:[#allocation7_spill]] }
   0x8   :  { %v2221_v0 = vld [vmem:[%s2950_s26 + $0x40] sm:$0xff]   ;;  %v2225_v4 = vld [vmem:[%s2950_s26 + $0x48] sm:$0xff]   ;;  %v2229_v8 = vld [vmem:[%s2950_s26 + $0x50] sm:$0xff]  }
   0x9   :  { %v2222_v1 = vld [vmem:[%s2950_s26 + $0xc0] sm:$0xff]   ;;  %1990 = vmatprep.subr.bf16.mxu0 %v2221_v0  ;;  %v2226_v5 = vld [vmem:[%s2950_s26 + $0xc8] sm:$0xff]   ;;  %v2230_v9 = vld [vmem:[%s2950_s26 + $0xd0] sm:$0xff]  }
   0xa   :  { %v2223_v2 = vld [vmem:[%s2950_s26] sm:$0xff]   ;;  %2012 = vmatprep.subr.bf16.mxu1 %v2222_v1  ;;  %v2227_v6 = vld [vmem:[%s2950_s26 + $0x8] sm:$0xff]   ;;  %v2231_v10 = vld [vmem:[%s2950_s26 + $0x10] sm:$0xff]  }
   0xb   :  { %v2224_v3 = vld [vmem:[%s2950_s26 + $0x80] sm:$0xff]   ;;  %1991 = vmatpush3.bf16.msra.mxu0 %v2223_v2  ;;  %v2228_v7 = vld [vmem:[%s2950_s26 + $0x88] sm:$0xff]   ;;  %v2232_v11 = vld [vmem:[%s2950_s26 + $0x90] sm:$0xff]  }
   0xc   :  { %2013 = vmatpush3.bf16.msra.mxu1 %v2224_v3  ;;  %1992 = vmatprep.subr.bf16.mxu0 %v2225_v4  ;;  %v2233_v12 = vld [vmem:[%s2950_s26 + $0x58] sm:$0xff]   ;;  %v2237_v16 = vld [vmem:[%s2950_s26 + $0x60] sm:$0xff]   ;;  %v2241_v20 = vld [vmem:[%s2950_s26 + $0x68] sm:$0xff]  }
   0xd   :  { %2014 = vmatprep.subr.bf16.mxu1 %v2226_v5  ;;  %v2234_v13 = vld [vmem:[%s2950_s26 + $0xd8] sm:$0xff]   ;;  %v2238_v17 = vld [vmem:[%s2950_s26 + $0xe0] sm:$0xff]   ;;  %v2242_v21 = vld [vmem:[%s2950_s26 + $0xe8] sm:$0xff]  }
   0xe   :  { %v2235_v14 = vld [vmem:[%s2950_s26 + $0x18] sm:$0xff]   ;;  %v2239_v18 = vld [vmem:[%s2950_s26 + $0x20] sm:$0xff]   ;;  %v2243_v22 = vld [vmem:[%s2950_s26 + $0x28] sm:$0xff]  }
   0xf   :  { %1993 = vmatpush3.bf16.msra.mxu0 %v2227_v6  ;;  %v2236_v15 = vld [vmem:[%s2950_s26 + $0x98] sm:$0xff]   ;;  %v2240_v19 = vld [vmem:[%s2950_s26 + $0xa0] sm:$0xff]   ;;  %v2244_v23 = vld [vmem:[%s2950_s26 + $0xa8] sm:$0xff]  }
  0x10   :  { %2015 = vmatpush3.bf16.msra.mxu1 %v2228_v7  ;;  %1994 = vmatprep.subr.bf16.mxu0 %v2229_v8  ;;  %v2245_v24 = vld [vmem:[%s2950_s26 + $0x70] sm:$0xff]   ;;  %v2249_v28 = vld [vmem:[%s2950_s26 + $0x78] sm:$0xff]   ;;  %v69_v32 = vld [vmem:[%s2951_s22] sm:$0x77] }
  0x11   :  { %2016 = vmatprep.subr.bf16.mxu1 %v2230_v9  ;;  %v2246_v25 = vld [vmem:[%s2950_s26 + $0xf0] sm:$0xff]   ;;  %v2250_v29 = vld [vmem:[%s2950_s26 + $0xf8] sm:$0xff]   ;;  %v70_v33 = vld [vmem:[%s2951_s22 + $0x8] sm:$0x77]  ;;  %v1833_v34 = vcombine.low %v69_v32, %v69_v32  ;;  %v1834_v35 = vcombine.high %v69_v32, %v69_v32 }
  0x12   :  { %v2247_v26 = vld [vmem:[%s2950_s26 + $0x30] sm:$0xff]   ;;  %v2251_v30 = vld [vmem:[%s2950_s26 + $0x38] sm:$0xff]   ;;  %v1835_v36 = vcombine.low %v70_v33, %v70_v33  ;;  %v1836_v37 = vcombine.high %v70_v33, %v70_v33  ;;  %v2257_v38 = vld [vmem:[%s2950_s26 + $0x140] sm:$0xff]  }
  0x13   :  { %1995 = vmatpush3.bf16.msra.mxu0 %v2231_v10  ;;  %v2248_v27 = vld [vmem:[%s2950_s26 + $0xb0] sm:$0xff]   ;;  %v2252_v31 = vld [vmem:[%s2950_s26 + $0xb8] sm:$0xff]   ;;  %v2258_v39 = vld [vmem:[%s2950_s26 + $0x1c0] sm:$0xff]   ;;  %652 = vmatprep.mubr.bf16.mxu0 %v1834_v35 }
  0x14   :  { %2017 = vmatpush3.bf16.msra.mxu1 %v2232_v11  ;;  %1996 = vmatprep.subr.bf16.mxu0 %v2233_v12  ;;  %v2259_v40 = vld [vmem:[%s2950_s26 + $0x100] sm:$0xff]   ;;  %v2261_v42 = vld [vmem:[%s2950_s26 + $0x148] sm:$0xff]   ;;  %v2265_v46 = vld [vmem:[%s2950_s26 + $0x150] sm:$0xff]   ;;  %v2316_v12 = vmov 0.0  }
  0x15   :  { %2018 = vmatprep.subr.bf16.mxu1 %v2234_v13  ;;  %692 = vmatprep.mubr.bf16.mxu1 %v1836_v37  ;;  %v2260_v41 = vld [vmem:[%s2950_s26 + $0x180] sm:$0xff]   ;;  %v2262_v43 = vld [vmem:[%s2950_s26 + $0x1c8] sm:$0xff]   ;;  %v2266_v47 = vld [vmem:[%s2950_s26 + $0x1d0] sm:$0xff]  }
  0x16   :  { %v2263_v44 = vld [vmem:[%s2950_s26 + $0x108] sm:$0xff]   ;;  %v2267_v48 = vld [vmem:[%s2950_s26 + $0x110] sm:$0xff]   ;;  %v2269_v50 = vld [vmem:[%s2950_s26 + $0x158] sm:$0xff]  }
  0x17   :  { %1997 = vmatpush3.bf16.msra.mxu0 %v2235_v14  ;;  %v2264_v45 = vld [vmem:[%s2950_s26 + $0x188] sm:$0xff]   ;;  %v2268_v49 = vld [vmem:[%s2950_s26 + $0x190] sm:$0xff]   ;;  %v2270_v51 = vld [vmem:[%s2950_s26 + $0x1d8] sm:$0xff]  }
  0x18   :  { %2019 = vmatpush3.bf16.msra.mxu1 %v2236_v15  ;;  %1998 = vmatprep.subr.bf16.mxu0 %v2237_v16  ;;  %v2271_v52 = vld [vmem:[%s2950_s26 + $0x118] sm:$0xff]   ;;  %v2273_v54 = vld [vmem:[%s2950_s26 + $0x160] sm:$0xff]   ;;  %v2277_v58 = vld [vmem:[%s2950_s26 + $0x168] sm:$0xff]  }
  0x19   :  { %2020 = vmatprep.subr.bf16.mxu1 %v2238_v17  ;;  %v2272_v53 = vld [vmem:[%s2950_s26 + $0x198] sm:$0xff]   ;;  %v2274_v55 = vld [vmem:[%s2950_s26 + $0x1e0] sm:$0xff]   ;;  %v2278_v59 = vld [vmem:[%s2950_s26 + $0x1e8] sm:$0xff]  }
  0x1a   :  { %v2275_v56 = vld [vmem:[%s2950_s26 + $0x120] sm:$0xff]   ;;  %v2279_v60 = vld [vmem:[%s2950_s26 + $0x128] sm:$0xff]   ;;  %v2281_v62 = vld [vmem:[%s2950_s26 + $0x170] sm:$0xff]  }
  0x1b   :  { %1999 = vmatpush3.bf16.msra.mxu0 %v2239_v18  ;;  %v2276_v57 = vld [vmem:[%s2950_s26 + $0x1a0] sm:$0xff]   ;;  %v2280_v61 = vld [vmem:[%s2950_s26 + $0x1a8] sm:$0xff]   ;;  %v2282_v63 = vld [vmem:[%s2950_s26 + $0x1f0] sm:$0xff]  }
  0x1c   :  { %2021 = vmatpush3.bf16.msra.mxu1 %v2240_v19  ;;  %2000 = vmatprep.subr.bf16.mxu0 %v2241_v20  ;;  %v2283_v0 = vld [vmem:[%s2950_s26 + $0x130] sm:$0xff]   ;;  %v2285_v2 = vld [vmem:[%s2950_s26 + $0x178] sm:$0xff]   ;;  %v2293_v13 = vld [vmem:[%s2952_s2] sm:$0xff]  }
  0x1d   :  { %2022 = vmatprep.subr.bf16.mxu1 %v2242_v21  ;;  %v2284_v1 = vld [vmem:[%s2950_s26 + $0x1b0] sm:$0xff]   ;;  %v2286_v3 = vld [vmem:[%s2950_s26 + $0x1f8] sm:$0xff]   ;;  %v2294_v14 = vld [vmem:[%s2952_s2 + $0x8] sm:$0xff]  }
  0x1e   :  { %v2287_v4 = vld [vmem:[%s2950_s26 + $0x138] sm:$0xff]   ;;  %v71_v6 = vld [vmem:[%s2951_s22 + $0x10] sm:$0x77]  ;;  %v1832_v17 = vld [vmem:[%s2953_s5] ss:$0 sm:$0xff] }
  0x1f   :  { %2001 = vmatpush3.bf16.msra.mxu0 %v2243_v22  ;;  %v2288_v5 = vld [vmem:[%s2950_s26 + $0x1b8] sm:$0xff]   ;;  %v1837_v7 = vcombine.low %v71_v6, %v71_v6  ;;  %v1838_v8 = vcombine.high %v71_v6, %v71_v6 }
  0x20   :  { %2023 = vmatpush3.bf16.msra.mxu1 %v2244_v23  ;;  %2002 = vmatprep.subr.bf16.mxu0 %v2245_v24  ;;  %v72_v9 = vld [vmem:[%s2951_s22 + $0x18] sm:$0x77] }
  0x21   :  { %2024 = vmatprep.subr.bf16.mxu1 %v2246_v25  ;;  %v1839_v10 = vcombine.low %v72_v9, %v72_v9  ;;  %v1840_v11 = vcombine.high %v72_v9, %v72_v9 }
  0x23   :  { %2003 = vmatpush3.bf16.msra.mxu0 %v2247_v26 }
  0x24   :  { %2025 = vmatpush3.bf16.msra.mxu1 %v2248_v27  ;;  %2004 = vmatprep.subr.bf16.mxu0 %v2249_v28 }
  0x25   :  { %2026 = vmatprep.subr.bf16.mxu1 %v2250_v29 }
  0x27   :  { %2005 = vmatpush3.bf16.msra.mxu0 %v2251_v30 }
  0x28   :  { %2027 = vmatpush3.bf16.msra.mxu1 %v2252_v31  ;;  %2034 = vmatprep.subr.bf16.mxu0 %v2257_v38 }
  0x29   :  { %2056 = vmatprep.subr.bf16.mxu1 %v2258_v39 }
  0x2a   :  { %653 = vmatmul.mubr.bf16.vlgmr.msra.gmra.mrb[0].mxu0 %v1833_v34 }
  0x2b   :  { %693 = vmatmul.mubr.bf16.vlgmr.msra.gmra.mrb[0].mxu1 %v1835_v36  ;;  %2035 = vmatpush3.bf16.msra.mxu0 %v2259_v40 }
  0x2c   :  { %2057 = vmatpush3.bf16.msra.mxu1 %v2260_v41  ;;  %2036 = vmatprep.subr.bf16.mxu0 %v2261_v42 }
  0x2d   :  { %2058 = vmatprep.subr.bf16.mxu1 %v2262_v43  ;;  %732 = vmatprep.mubr.bf16.mxu0 %v1838_v8  ;;  %v2295_v43 = vld [vmem:[%s2954_s0] sm:$0xff]  }
  0x2e   :  { %772 = vmatprep.mubr.bf16.mxu1 %v1840_v11  ;;  %v2299_v11 = vld [vmem:[%s2923_s10] sm:$0xff]  }
  0x2f   :  { %2037 = vmatpush3.bf16.msra.mxu0 %v2263_v44 }
  0x30   :  { %2059 = vmatpush3.bf16.msra.mxu1 %v2264_v45  ;;  %2038 = vmatprep.subr.bf16.mxu0 %v2265_v46  ;;  %v2296_v45 = vld [vmem:[%s2954_s0 + $0x8] sm:$0xff]  }
  0x31   :  { %2060 = vmatprep.subr.bf16.mxu1 %v2266_v47 }
  0x33   :  { %2039 = vmatpush3.bf16.msra.mxu0 %v2267_v48 }
  0x34   :  { %2061 = vmatpush3.bf16.msra.mxu1 %v2268_v49  ;;  %2040 = vmatprep.subr.bf16.mxu0 %v2269_v50 }
  0x35   :  { %2062 = vmatprep.subr.bf16.mxu1 %v2270_v51  ;;  %v2297_v51 = vld [vmem:[%s2955_s27] sm:$0xff]  }
  0x37   :  { %2041 = vmatpush3.bf16.msra.mxu0 %v2271_v52  ;;  %v2298_v52 = vld [vmem:[%s2955_s27 + $0x8] sm:$0xff]  }
  0x38   :  { %2063 = vmatpush3.bf16.msra.mxu1 %v2272_v53  ;;  %2042 = vmatprep.subr.bf16.mxu0 %v2273_v54  ;;  %v2301_v53 = vld [vmem:[%s2924_s8] sm:$0xff]   ;;  %v2302_v54 = vld [vmem:[%s2924_s8 + $0x8] sm:$0xff]  }
  0x39   :  { %2064 = vmatprep.subr.bf16.mxu1 %v2274_v55  ;;  %v2319_v55 = vmov 1966171168  }
  0x3b   :  { %2043 = vmatpush3.bf16.msra.mxu0 %v2275_v56  ;;  %v922_v56 = vunpack.c.l.s4 %v2319_v55 }
  0x3c   :  { %2065 = vmatpush3.bf16.msra.mxu1 %v2276_v57  ;;  %2044 = vmatprep.subr.bf16.mxu0 %v2277_v58  ;;  %v924_v57 = vlaneseq }
  0x3d   :  { %2066 = vmatprep.subr.bf16.mxu1 %v2278_v59  ;;  %v923_v58 = vunpack.c.0.s8 %v922_v56 }
  0x3e   :  { %v925_v59 = vshrl.u32 %v924_v57, 7  ;;  %v2311_v57 = vld [vmem:[%s2929_s14 + $0x10] sm:$0xff]  }
  0x3f   :  { %2045 = vmatpush3.bf16.msra.mxu0 %v2279_v60 }
  0x40   :  { %2067 = vmatpush3.bf16.msra.mxu1 %v2280_v61  ;;  %2046 = vmatprep.subr.bf16.mxu0 %v2281_v62  ;;  %v2686_v60 = vsub.s32 %v923_v58, %v925_v59  ;;  %v2312_v58 = vld [vmem:[%s2929_s14 + $0x18] sm:$0xff]  }
  0x41   :  { %2068 = vmatprep.subr.bf16.mxu1 %v2282_v63  ;;  %v2689_v63 = vsub.s32 0, %v925_v59  ;;  %v1927_v59 = vld [vmem:[%s2930_s13] ss:$0 sm:$0xff] }
  0x43   :  { %2047 = vmatpush3.bf16.msra.mxu0 %v2283_v0 }
  0x44   :  { %2069 = vmatpush3.bf16.msra.mxu1 %v2284_v1  ;;  %2048 = vmatprep.subr.bf16.mxu0 %v2285_v2 }
  0x45   :  { %2070 = vmatprep.subr.bf16.mxu1 %v2286_v3 }
  0x47   :  { %2049 = vmatpush3.bf16.msra.mxu0 %v2287_v4 }
  0x48   :  { %2071 = vmatpush3.bf16.msra.mxu1 %v2288_v5  ;;  %2118 = vmatprep.subr.bf16.mxu0 %v2316_v12 }
  0x49   :  { %2142 = vmatprep.subr.bf16.mxu1 %v2316_v12 }
  0x4a   :  { %733 = vmatmul.mubr.bf16.vlgmr.msra.gmra.mrb[4].mxu0 %v1837_v7  ;;  %v2697_v7 = vld [vmem:[%s2925_s3] sm:$0xff] }
  0x4b   :  { %773 = vmatmul.mubr.bf16.vlgmr.msra.gmra.mrb[4].mxu1 %v1839_v10  ;;  %2122 = vmatprep.mubr.msk.bf16.mxu0 %vm2317_vm0, %v2316_v12 }
  0x4c   :  { %2150 = vmatprep.mubr.msk.bf16.mxu1 %vm2317_vm0, %v2316_v12  ;;  %2119 = vmatpush3.bf16.msra.mxu0 %v2293_v13 }
  0x4d   :  { %2120 = vmatprep.subr.bf16.mxu0 %v2316_v12  ;;  %2143 = vmatpush3.bf16.msra.mxu1 %v2301_v53 }
  0x4e   :  { %2144 = vmatprep.subr.bf16.mxu1 %v2316_v12 }
  0x50   :  { %2121 = vmatpush3.bf16.msra.mxu0 %v2294_v14  ;;  %v2300_v14 = vld [vmem:[%s2923_s10 + $0x8] sm:$0xff]  }
  0x51   :  { %2126 = vmatprep.subr.bf16.mxu0 %v2316_v12  ;;  %2145 = vmatpush3.bf16.msra.mxu1 %v2302_v54 }
  0x52   :  { %2146 = vmatprep.subr.bf16.mxu1 %v2316_v12 }
  0xfd   :  { %v2006_v15 = vpop.f32.mrb[0].mxu0 }
  0xfe   :  { %v2028_v16 = vpop.f32.mrb[0].mxu1  ;;  %v2007_v18 = vpop.f32.mrb[1].mxu0 }
  0xff   :  { %v2029_v19 = vpop.f32.mrb[1].mxu1  ;;  %v2008_v20 = vadd.f32 %v2007_v18, %v2006_v15  ;;  %v2009_v22 = vpop.f32.mrb[2].mxu0  ;;  %v2305_v18 = vld [vmem:[%s2924_s8 + $0x18] sm:$0xff]  }
 0x100   :  { %v2030_v21 = vadd.f32 %v2029_v19, %v2028_v16  ;;  %v2031_v23 = vpop.f32.mrb[2].mxu1  ;;  %v2010_v24 = vpop.f32.mrb[3].mxu0  ;;  %v2303_v16 = vld [vmem:[%s2924_s8 + $0x10] sm:$0xff]   ;;  %v2306_v19 = vld [vmem:[%s2926_s11 + $0x8] sm:$0xff]  }
 0x101   :  { %v2032_v25 = vpop.f32.mrb[3].mxu1  ;;  %v655_v26 = vadd.f32 %v2008_v20, %v1832_v17  ;;  %2147 = vmatpush3.bf16.msra.mxu1 %v2303_v16  ;;  %v2304_v17 = vld [vmem:[%s2926_s11] sm:$0xff]  }
 0x102   :  { %2148 = vmatprep.subr.bf16.mxu1 %v2316_v12  ;;  %v1911_v20 = vld [vmem:[%s2927_s7] ss:$0 sm:$0xff] }
 0x103   :  { %v695_v27 = vadd.f32 %v2030_v21, %v655_v26 }
 0x105   :  { %2149 = vmatpush3.bf16.msra.mxu1 %v2305_v18 }
 0x106   :  { %2170 = vmatprep.subr.bf16.mxu1 %v2316_v12 }
 0x11d   :  { %v2050_v28 = vpop.f32.mrb[4].mxu0 }
 0x11e   :  { %v2072_v29 = vpop.f32.mrb[4].mxu1  ;;  %v2051_v30 = vpop.f32.mrb[5].mxu0 }
 0x11f   :  { %v2073_v31 = vpop.f32.mrb[5].mxu1  ;;  %v2052_v32 = vadd.f32 %v2051_v30, %v2050_v28  ;;  %v2053_v34 = vpop.f32.mrb[6].mxu0 }
 0x120   :  { %v2074_v33 = vadd.f32 %v2073_v31, %v2072_v29  ;;  %v2075_v35 = vpop.f32.mrb[6].mxu1  ;;  %v2054_v36 = vpop.f32.mrb[7].mxu0 }
 0x121   :  { %v2076_v37 = vpop.f32.mrb[7].mxu1  ;;  %v735_v38 = vadd.f32 %v2052_v32, %v695_v27  ;;  %v2307_v35 = vld [vmem:[%s2928_s12] sm:$0xff]   ;;  %v2308_v36 = vld [vmem:[%s2928_s12 + $0x8] sm:$0xff]  }
 0x122   :  { %v2309_v37 = vld [vmem:[%s2929_s14] sm:$0xff]  }
 0x123   :  { %v2652_v39 = vadd.f32 %v2074_v33, %v735_v38  ;;  %v2310_v38 = vld [vmem:[%s2929_s14 + $0x8] sm:$0xff]  }
 0x125   :  { %v803_v40 = vpack.c.bf16 %v2652_v39, %v2652_v39 }
 0x127   :  { %v805_v41 = vrot.slane %v803_v40, 1  ;;  %v1120_v42 = vrot.slane %v803_v40, 2 }
 0x129   :  { %806 = vrot.lane.b32.xlu0 %v805_v41, %s2318_s30 }
 0x12d   :  { %1121 = vrot.lane.b32.xlu0 %v1120_v42, %s2318_s30 }
 0x19b   :  { %v807_v44 = vpop.permute.xlu0 %806 }
 0x19c   :  { %2123 = vmatmul.mubr.msk.bf16.vlgmr.msra.gmra.mrb[8].mxu0 %vm820_vm1, %v807_v44 }
 0x19d   :  { %2127 = vmatpush3.bf16.msra.mxu0 %v2295_v43  ;;  %2130 = vmatprep.mubr.msk.bf16.mxu0 %vm2317_vm0, %v2316_v12 }
 0x19e   :  { %2128 = vmatprep.subr.bf16.mxu0 %v2316_v12 }
 0x19f   :  { %v1122_v15 = vpop.permute.xlu0 %1121 }
 0x1a1   :  { %2129 = vmatpush3.bf16.msra.mxu0 %v2296_v45 }
 0x1a2   :  { %2134 = vmatprep.subr.bf16.mxu0 %v2316_v12 }
 0x26f   :  { %v858_v46 = vpop.f32.mrb[8].mxu0 }
 0x270   :  { %v864_v47 = vpack.c.bf16 %v858_v46, %v858_v46  ;;  %v2124_v48 = vpop.f32.mrb[9].mxu0 }
 0x271   :  { %v861_v49 = vpop.f32.mrb[10].mxu0 }
 0x272   :  { %v2125_v50 = vpop.f32.mrb[11].mxu0  ;;  %2131 = vmatmul.mubr.msk.bf16.vlgmr.msra.gmra.mrb[12].mxu0 %vm820_vm1, %v864_v47 }
 0x273   :  { %2138 = vmatprep.mubr.msk.bf16.mxu0 %vm2317_vm0, %v2316_v12  ;;  %2135 = vmatpush3.bf16.msra.mxu0 %v2297_v51 }
 0x274   :  { %2136 = vmatprep.subr.bf16.mxu0 %v2316_v12 }
 0x277   :  { %2137 = vmatpush3.bf16.msra.mxu0 %v2298_v52 }
 0x278   :  { %2154 = vmatprep.subr.bf16.mxu0 %v2316_v12 }
 0x345   :  { %v914_v61 = vpop.f32.mrb[12].mxu0 }
 0x346   :  { %v927_v62 = vrot.slane %v914_v61, %v2686_v60  ;;  %v2132_v0 = vpop.f32.mrb[13].mxu0 }
 0x347   :  { %v917_v1 = vpop.f32.mrb[14].mxu0 }
 0x348   :  { %v928_v2 = vcombine.high %v927_v62, %v927_v62  ;;  %v935_v3 = vrot.slane %v927_v62, %v2686_v60  ;;  %v2133_v4 = vpop.f32.mrb[15].mxu0 }
 0x34a   :  { %v942_v5 = vrot.slane %v928_v2, %v2686_v60  ;;  %v946_v6 = vrot.slane %v935_v3, %v2689_v63 }
 0x34c   :  { %v950_v8 = vrot.slane %v942_v5, %v2689_v63  ;;  %v2701_v9 = vadd.f32 %v946_v6, %v2697_v7 }
 0x34e   :  { %v2704_v10 = vadd.f32 %v950_v8, %v2697_v7  ;;  %v2314_v8 = vld [vmem:[%s2931_s16 + $0x8] sm:$0xff]  }
 0x350   :  { %v955_v13 = vpack.c.bf16 %v2704_v10, %v2701_v9 }
 0x352   :  { %2139 = vmatmul.mubr.msk.bf16.vlgmr.msra.gmra.mrb[16].mxu0 %vm820_vm1, %v955_v13  ;;  %v1931_v13 = vld [vmem:[%s2933_s15] ss:$0 sm:$0xff] }
 0x353   :  { %2155 = vmatpush3.bf16.msra.mxu0 %v2299_v11  ;;  %2158 = vmatprep.mubr.msk.bf16.mxu0 %vm2317_vm0, %v2316_v12  ;;  %v1915_v11 = vld [vmem:[%s2932_s9] ss:$0 sm:$0xff] }
 0x354   :  { %2156 = vmatprep.subr.bf16.mxu0 %v2316_v12 }
 0x357   :  { %2157 = vmatpush3.bf16.msra.mxu0 %v2300_v14 }
 0x358   :  { %2162 = vmatprep.subr.bf16.mxu0 %v2316_v12 }
 0x35a   :  { %2159 = vmatmul.mubr.msk.bf16.vlgmr.msra.gmra.mrb[20].mxu0 %vm820_vm1, %v1122_v15 }
 0x35b   :  { %2166 = vmatprep.mubr.msk.bf16.mxu0 %vm2317_vm0, %v2316_v12  ;;  %2163 = vmatpush3.bf16.msra.mxu0 %v2304_v17 }
 0x35c   :  { %2164 = vmatprep.subr.bf16.mxu0 %v2316_v12 }
 0x35f   :  { %2165 = vmatpush3.bf16.msra.mxu0 %v2306_v19 }
 0x360   :  { %2178 = vmatprep.subr.bf16.mxu0 %v2316_v12 }
 0x425   :  { %v1011_v21 = vpop.f32.mrb[16].mxu0 }
 0x426   :  { %v1012_v22 = vadd.f32 %v1911_v20, %v1011_v21  ;;  %v2140_v23 = vpop.f32.mrb[17].mxu0 }
 0x427   :  { %v1014_v24 = vpop.f32.mrb[18].mxu0 }
 0x428   :  { %v1015_v25 = vadd.f32 %v1911_v20, %v1014_v24  ;;  %v2141_v26 = vpop.f32.mrb[19].mxu0  ;;  %v1018_v27 = vmax.f32 %v1012_v22, 0.0 }
 0x42a   :  { %v1019_v28 = vmax.f32 %v1015_v25, 0.0 }
 0x42c   :  { %v1020_v29 = vpack.c.bf16 %v1019_v28, %v1018_v27 }
 0x42d   :  { %v1172_v30 = vpop.f32.mrb[20].mxu0 }
 0x42e   :  { %v1178_v31 = vpack.c.bf16 %v1172_v30, %v1172_v30  ;;  %2151 = vmatmul.mubr.msk.bf16.vlgmr.msra.gmra.mrb[8].mxu1 %vm1051_vm2, %v1020_v29  ;;  %v2160_v32 = vpop.f32.mrb[21].mxu0 }
 0x42f   :  { %v1175_v33 = vpop.f32.mrb[22].mxu0  ;;  %2174 = vmatprep.mubr.msk.bf16.mxu1 %vm2317_vm0, %v2316_v12  ;;  %2171 = vmatpush3.bf16.msra.mxu1 %v2307_v35 }
 0x430   :  { %v2161_v34 = vpop.f32.mrb[23].mxu0  ;;  %2167 = vmatmul.mubr.msk.bf16.vlgmr.msra.gmra.mrb[24].mxu0 %vm820_vm1, %v1178_v31  ;;  %2172 = vmatprep.subr.bf16.mxu1 %v2316_v12 }
 0x431   :  { %2186 = vmatprep.mubr.msk.bf16.mxu0 %vm2317_vm0, %v2316_v12  ;;  %2179 = vmatpush3.bf16.msra.mxu0 %v2309_v37 }
 0x432   :  { %2180 = vmatprep.subr.bf16.mxu0 %v2316_v12 }
 0x433   :  { %2173 = vmatpush3.bf16.msra.mxu1 %v2308_v36 }
 0x434   :  { %2190 = vmatprep.subr.bf16.mxu1 %v2316_v12 }
 0x435   :  { %2181 = vmatpush3.bf16.msra.mxu0 %v2310_v38 }
 0x436   :  { %2182 = vmatprep.subr.bf16.mxu0 %v2316_v12 }
 0x439   :  { %2183 = vmatpush3.bf16.msra.mxu0 %v2311_v57 }
 0x43a   :  { %2184 = vmatprep.subr.bf16.mxu0 %v2316_v12 }
 0x43d   :  { %2185 = vmatpush3.bf16.msra.mxu0 %v2312_v58  ;;  %v1952_v58 = vld [vmem:[%s2936_s18] sm:$0xff]  }
 0x501   :  { %v1089_v40 = vpop.f32.mrb[8].mxu1 }
 0x502   :  { %v2152_v41 = vpop.f32.mrb[9].mxu1  ;;  %v1090_v14 = vadd.f32 %v1915_v11, %v1089_v40 }
 0x503   :  { %v1092_v42 = vpop.f32.mrb[10].mxu1  ;;  %v1228_v43 = vpop.f32.mrb[24].mxu0 }
 0x504   :  { %v1241_v44 = vrot.slane %v1228_v43, %v2686_v60  ;;  %v2153_v45 = vpop.f32.mrb[11].mxu1  ;;  %v2168_v46 = vpop.f32.mrb[25].mxu0  ;;  %v1093_v16 = vadd.f32 %v1915_v11, %v1092_v42  ;;  %v1096_v20 = vadd.f32 %v1090_v14, %v2701_v9  ;;  %v2838_v11 = vld [vmem:[%s2936_s18 + $0x30] sm:$0xff]  }
 0x505   :  { %v1231_v47 = vpop.f32.mrb[26].mxu0  ;;  %v2315_v45 = vld [vmem:[%s2934_s19] sm:$0xff]   ;;  %s2320_s19 = smov 112  }
 0x506   :  { %v1242_v48 = vcombine.high %v1241_v44, %v1241_v44  ;;  %v1249_v49 = vrot.slane %v1241_v44, %v2686_v60  ;;  %v2169_v50 = vpop.f32.mrb[27].mxu0  ;;  %v1097_v23 = vadd.f32 %v1093_v16, %v2704_v10  ;;  %v1937_v46 = vld [vmem:[%s2935_s17] ss:$0 sm:$0xff] }
 0x508   :  { %v1256_v51 = vrot.slane %v1242_v48, %v2686_v60  ;;  %v1260_v52 = vrot.slane %v1249_v49, %v2689_v63 }
 0x50a   :  { %v1264_v53 = vrot.slane %v1256_v51, %v2689_v63  ;;  %v1267_v54 = vadd.f32 %v1260_v52, %v2697_v7 }
 0x50c   :  { %v1268_v55 = vadd.f32 %v1264_v53, %v2697_v7  ;;  %v2313_v7 = vld [vmem:[%s2931_s16] sm:$0xff]  }
 0x50e   :  { %v1269_v56 = vpack.c.bf16 %v1268_v55, %v1267_v54 }
 0x510   :  { %2175 = vmatmul.mubr.msk.bf16.vlgmr.msra.gmra.mrb[12].mxu1 %vm820_vm1, %v1269_v56 }
 0x511   :  { %2194 = vmatprep.mubr.msk.bf16.mxu1 %vm2317_vm0, %v2316_v12  ;;  %2191 = vmatpush3.bf16.msra.mxu1 %v2313_v7 }
 0x512   :  { %2192 = vmatprep.subr.bf16.mxu1 %v2316_v12 }
 0x515   :  { %2193 = vmatpush3.bf16.msra.mxu1 %v2314_v8 }
 0x516   :  { %2198 = vmatprep.subr.bf16.mxu1 %v2315_v45 }
 0x5e3   :  { %v1325_v61 = vpop.f32.mrb[12].mxu1 }
 0x5e4   :  { %v1326_v62 = vadd.f32 %v1927_v59, %v1325_v61  ;;  %v2176_v0 = vpop.f32.mrb[13].mxu1  ;;  %v1983_v61 = vld [vmem:[%s2936_s18 + $0x8] sm:$0xff]  }
 0x5e5   :  { %v1328_v1 = vpop.f32.mrb[14].mxu1  ;;  %v1986_v0 = vld [vmem:[%s2936_s18 + $0x20] sm:$0xff]  }
 0x5e6   :  { %v1329_v2 = vadd.f32 %v1927_v59, %v1328_v1  ;;  %v2177_v3 = vpop.f32.mrb[15].mxu1  ;;  %v1332_v4 = vmax.f32 %v1326_v62, 0.0  ;;  %v1984_v62 = vld [vmem:[%s2936_s18 + $0x10] sm:$0xff]   ;;  %v1969_v16 = vunpack.c.l.bf16 %v1986_v0 }
 0x5e7   :  { %v1954_v3 = vunpack.c.h.bf16 %v1952_v58  ;;  %v1961_v7 = vunpack.c.l.bf16 %v1984_v62  ;;  %v1962_v8 = vunpack.c.h.bf16 %v1984_v62 }
 0x5e8   :  { %v1333_v5 = vmax.f32 %v1329_v2, 0.0  ;;  %v1953_v2 = vunpack.c.l.bf16 %v1952_v58 }
 0x5ea   :  { %v1334_v6 = vpack.c.bf16 %v1333_v5, %v1332_v4  ;;  %v2833_v4 = vld [vmem:[%s2936_s18 + $0x28] sm:$0xff]   ;;  %v1957_v5 = vunpack.c.l.bf16 %v1983_v61 }
 0x5ec   :  { %2187 = vmatmul.mubr.msk.bf16.vlgmr.msra.gmra.mrb[28].mxu0 %vm1051_vm2, %v1334_v6  ;;  %v1958_v6 = vunpack.c.h.bf16 %v1983_v61 }
 0x6bf   :  { %v1402_v15 = vpop.f32.mrb[28].mxu0 }
 0x6c0   :  { %v1403_v17 = vadd.f32 %v1931_v13, %v1402_v15  ;;  %v2188_v18 = vpop.f32.mrb[29].mxu0 }
 0x6c1   :  { %v1405_v19 = vpop.f32.mrb[30].mxu0  ;;  %v1973_v18 = vunpack.c.l.bf16 %v2833_v4 }
 0x6c2   :  { %v1409_v21 = vadd.f32 %v1403_v17, %v1267_v54  ;;  %v1406_v22 = vadd.f32 %v1931_v13, %v1405_v19  ;;  %v2189_v12 = vpop.f32.mrb[31].mxu0  ;;  %v1970_v17 = vunpack.c.h.bf16 %v1986_v0  ;;  %v1974_v19 = vunpack.c.h.bf16 %v2833_v4  ;;  %v1989_v0 = vld [vmem:[%s2936_s18 + $0x38] sm:$0xff]  }
 0x6c4   :  { %v1411_v24 = vsub.f32 %v1409_v21, %v1096_v20  ;;  %v1410_v25 = vadd.f32 %v1406_v22, %v1268_v55  ;;  %v1977_v21 = vunpack.c.l.bf16 %v2838_v11  ;;  %v1978_v22 = vunpack.c.h.bf16 %v2838_v11 }
 0x6c5   :  { %v1981_v11 = vunpack.c.l.bf16 %v1989_v0 }
 0x6c6   :  { %v1413_v26 = vsel %vm820_vm1, %v1411_v24, 0.0  ;;  %v1412_v27 = vsub.f32 %v1410_v25, %v1097_v23 }
 0x6c7   :  { %v1414_v28 = vrot.slane %v1413_v26, 4 }
 0x6c8   :  { %v1420_v29 = vsel %vm820_vm1, %v1412_v27, 0.0 }
 0x6c9   :  { %v1415_v30 = vadd.f32 %v1414_v28, %v1413_v26  ;;  %v1421_v31 = vrot.slane %v1420_v29, 4 }
 0x6cb   :  { %v1416_v32 = vrot.slane %v1415_v30, 2  ;;  %v1422_v33 = vadd.f32 %v1421_v31, %v1420_v29 }
 0x6cd   :  { %v1417_v34 = vadd.f32 %v1416_v32, %v1415_v30  ;;  %v1423_v35 = vrot.slane %v1422_v33, 2 }
 0x6cf   :  { %v1418_v9 = vrot.slane %v1417_v34, 1  ;;  %v1424_v36 = vadd.f32 %v1423_v35, %v1422_v33 }
 0x6d1   :  { %v1419_v37 = vadd.f32 %v1418_v9, %v1417_v34  ;;  %v1425_v38 = vrot.slane %v1424_v36, 1 }
 0x6d3   :  { %v1426_v40 = vadd.f32 %v1425_v38, %v1424_v36  ;;  %v1427_v10 = vmul.f32 0.125, %v1419_v37 }
 0x6d5   :  { %v1428_v41 = vmul.f32 0.125, %v1426_v40 }
 0x6d7   :  { %v1432_v42 = vsel %vm1431_vm3, %v1428_v41, %v1427_v10 }
 0x6d8   :  { %v1434_v43 = vadd.f32 %v1432_v42, %v2652_v39 }
 0x6da   :  { %v1435_v44 = vpack.c.bf16 %v1434_v43, %v1434_v43 }
 0x6dc   :  { %2195 = vmatmul.mubr.msk.bf16.vlgmr.msra.gmra.mrb[16].mxu1 %vm820_vm1, %v1435_v44 }
 0x6dd   :  { %2199 = vmatpush3.bf16.msra.mxu1 %v2315_v45 }
 0x7af   :  { %v1496_v47 = vpop.f32.mrb[16].mxu1 }
 0x7b0   :  { %v1497_v48 = vadd.f32 %v1937_v46, %v1496_v47  ;;  %v2196_v49 = vpop.f32.mrb[17].mxu1 }
 0x7b1   :  { %v1499_v50 = vpop.f32.mrb[18].mxu1 }
 0x7b2   :  { %v1541_v51 = vrot.slane %v1497_v48, %v2686_v60  ;;  %v2197_v39 = vpop.f32.mrb[19].mxu1 }
 0x7b4   :  { %v1542_v52 = vcombine.high %v1541_v51, %v1541_v51  ;;  %v1549_v53 = vrot.slane %v1541_v51, %v2686_v60 }
 0x7b6   :  { %v1592_v54 = vrot.slane %v1549_v53, %v2689_v63  ;;  %v1556_v55 = vrot.slane %v1542_v52, %v2686_v60  ;;  %v1559_v57 = vadd.f32 1.0, %v1549_v53  ;;  %v1985_v60 = vld [vmem:[%s2936_s18 + $0x18] sm:$0xff]  }
 0x7b7   :  { %v1965_v14 = vunpack.c.l.bf16 %v1985_v60  ;;  %v1966_v15 = vunpack.c.h.bf16 %v1985_v60 }
 0x7b8   :  { %1597 = vrot.lane.b32.xlu1 %v1592_v54, %s2320_s19  ;;  %v1596_v56 = vrot.slane %v1556_v55, %v2689_v63  ;;  %v1560_v59 = vadd.f32 1.0, %v1556_v55  ;;  %v1566_v1 = vrot.slane %v1559_v57, %v2689_v63 }
 0x7ba   :  { %v2841_v13 = vrot.slane %v1560_v59, %v2689_v63  ;;  %v1573_v20 = vmul.f32 %v1953_v2, %v1566_v1  ;;  %v1574_v12 = vmul.f32 %v1954_v3, %v1566_v1  ;;  %v1575_v23 = vmul.f32 %v1957_v5, %v1566_v1 }
 0x7bb   :  { %v1576_v24 = vmul.f32 %v1958_v6, %v1566_v1  ;;  %v1577_v25 = vmul.f32 %v1961_v7, %v1566_v1  ;;  %v1578_v26 = vmul.f32 %v1962_v8, %v1566_v1  ;;  %v1579_v27 = vmul.f32 %v1965_v14, %v1566_v1 }
 0x7bc   :  { %1599 = vrot.lane.b32.xlu1 %v1596_v56, %s2320_s19  ;;  %v1580_v28 = vmul.f32 %v1966_v15, %v1566_v1  ;;  %v1581_v29 = vmul.f32 %v1969_v16, %v2841_v13  ;;  %v1582_v50 = vmul.f32 %v1970_v17, %v2841_v13  ;;  %v1583_v51 = vmul.f32 %v1973_v18, %v2841_v13 }
 0x7bd   :  { %v1584_v58 = vmul.f32 %v1974_v19, %v2841_v13  ;;  %v1585_v59 = vmul.f32 %v1977_v21, %v2841_v13  ;;  %v1586_v60 = vmul.f32 %v1978_v22, %v2841_v13  ;;  %v1982_v14 = vunpack.c.h.bf16 %v1989_v0 }
 0x7be   :  { %v1587_v21 = vmul.f32 %v1981_v11, %v2841_v13 }
 0x7bf   :  { %v1588_v22 = vmul.f32 %v1982_v14, %v2841_v13  ;;  %v1941_v13 = vld [vmem:[%s2937_s20] ss:$0 sm:$0xff] }
 0x82a   :  { %v1598_v63 = vpop.permute.xlu1 %1597 }
 0x82b   :  { %v1603_v30 = vadd.f32 %v1598_v63, %v1573_v20  ;;  %v1604_v31 = vadd.f32 %v1598_v63, %v1574_v12  ;;  %v1605_v32 = vadd.f32 %v1598_v63, %v1575_v23  ;;  %v1606_v33 = vadd.f32 %v1598_v63, %v1576_v24 }
 0x82c   :  { %v1607_v34 = vadd.f32 %v1598_v63, %v1577_v25  ;;  %v1608_v35 = vadd.f32 %v1598_v63, %v1578_v26  ;;  %v1609_v9 = vadd.f32 %v1598_v63, %v1579_v27  ;;  %v1610_v36 = vadd.f32 %v1598_v63, %v1580_v28 }
 0x82d   :  { %vm1619_vm5 = vcmp.ge.f32.partialorder %v1603_v30, 0.0  ;;  %vm1620_vm6 = vcmp.ge.f32.partialorder %v1604_v31, 0.0  ;;  %v1635_v37 = vmul.f32 0.2, %v1603_v30  ;;  %v1636_v38 = vmul.f32 0.2, %v1604_v31 }
 0x82e   :  { %vm1621_vm7 = vcmp.ge.f32.partialorder %v1605_v32, 0.0  ;;  %vm1622_vm8 = vcmp.ge.f32.partialorder %v1606_v33, 0.0  ;;  %v1637_v40 = vmul.f32 0.2, %v1605_v32  ;;  %v1638_v10 = vmul.f32 0.2, %v1606_v33  ;;  %v1600_v41 = vpop.permute.xlu1 %1599 }
 0x82f   :  { %v1651_v42 = vsel %vm1619_vm5, %v1603_v30, %v1635_v37  ;;  %v1652_v43 = vsel %vm1620_vm6, %v1604_v31, %v1636_v38  ;;  %vm1623_vm9 = vcmp.ge.f32.partialorder %v1607_v34, 0.0  ;;  %vm1624_vm10 = vcmp.ge.f32.partialorder %v1608_v35, 0.0 }
 0x830   :  { %v1667_v44 = vpack.c.bf16 %v1652_v43, %v1651_v42  ;;  %v1653_v45 = vsel %vm1621_vm7, %v1605_v32, %v1637_v40  ;;  %v1654_v46 = vsel %vm1622_vm8, %v1606_v33, %v1638_v10  ;;  %v1639_v47 = vmul.f32 0.2, %v1607_v34 }
 0x831   :  { %v1668_v48 = vpack.c.bf16 %v1654_v46, %v1653_v45  ;;  %v1640_v49 = vmul.f32 0.2, %v1608_v35  ;;  %v1641_v52 = vmul.f32 0.2, %v1609_v9  ;;  %v1642_v53 = vmul.f32 0.2, %v1610_v36 }
 0x832   :  { %2200 = vmatprep.mubr.msk.bf16.mxu1 %vm1690_vm4, %v1667_v44  ;;  %v1655_v39 = vsel %vm1623_vm9, %v1607_v34, %v1639_v47  ;;  %v1611_v54 = vadd.f32 %v1600_v41, %v1581_v29  ;;  %vm1625_vm11 = vcmp.ge.f32.partialorder %v1609_v9, 0.0  ;;  %vm1626_vm12 = vcmp.ge.f32.partialorder %v1610_v36, 0.0 }
 0x833   :  { %2201 = vmatmul.mubr.msk.bf16.vlgmr.msra.gmra.mrb[20].mxu1 %vm1690_vm4, %v1668_v48  ;;  %v1656_v55 = vsel %vm1624_vm10, %v1608_v35, %v1640_v49  ;;  %v1612_v56 = vadd.f32 %v1600_v41, %v1582_v50  ;;  %v1657_v1 = vsel %vm1625_vm11, %v1609_v9, %v1641_v52  ;;  %v1658_v2 = vsel %vm1626_vm12, %v1610_v36, %v1642_v53 }
 0x834   :  { %v1669_v57 = vpack.c.bf16 %v1656_v55, %v1655_v39  ;;  %vm1627_vm13 = vcmp.ge.f32.partialorder %v1611_v54, 0.0  ;;  %v1643_v61 = vmul.f32 0.2, %v1611_v54  ;;  %v1613_v3 = vadd.f32 %v1600_v41, %v1583_v51 }
 0x835   :  { %vm1628_vm14 = vcmp.ge.f32.partialorder %v1612_v56, 0.0  ;;  %v1644_v62 = vmul.f32 0.2, %v1612_v56  ;;  %v1614_v4 = vadd.f32 %v1600_v41, %v1584_v58  ;;  %v1615_v7 = vadd.f32 %v1600_v41, %v1585_v59 }
 0x836   :  { %2204 = vmatprep.mubr.msk.bf16.mxu1 %vm1690_vm4, %v1669_v57  ;;  %v1659_v5 = vsel %vm1627_vm13, %v1611_v54, %v1643_v61  ;;  %v1616_v8 = vadd.f32 %v1600_v41, %v1586_v60  ;;  %v1670_v15 = vpack.c.bf16 %v1658_v2, %v1657_v1  ;;  %v1645_v17 = vmul.f32 0.2, %v1613_v3 }
 0x837   :  { %v1660_v6 = vsel %vm1628_vm14, %v1612_v56, %v1644_v62  ;;  %v1646_v18 = vmul.f32 0.2, %v1614_v4  ;;  %vm1629_vm15 = vcmp.ge.f32.partialorder %v1613_v3, 0.0  ;;  %vm1630_vm0 = vcmp.ge.f32.partialorder %v1614_v4, 0.0 }
 0x838   :  { %v1671_v16 = vpack.c.bf16 %v1660_v6, %v1659_v5  ;;  %v1647_v19 = vmul.f32 0.2, %v1615_v7  ;;  %v1648_v20 = vmul.f32 0.2, %v1616_v8  ;;  %vm1631_vm1 = vcmp.ge.f32.partialorder %v1615_v7, 0.0 }
 0x839   :  { %vm1632_vm2 = vcmp.ge.f32.partialorder %v1616_v8, 0.0  ;;  %v1661_v12 = vsel %vm1629_vm15, %v1613_v3, %v1645_v17  ;;  %v1662_v23 = vsel %vm1630_vm0, %v1614_v4, %v1646_v18  ;;  %v1617_v24 = vadd.f32 %v1600_v41, %v1587_v21 }
 0x83a   :  { %v1618_v25 = vadd.f32 %v1600_v41, %v1588_v22  ;;  %v1663_v63 = vsel %vm1631_vm1, %v1615_v7, %v1647_v19  ;;  %v1664_v26 = vsel %vm1632_vm2, %v1616_v8, %v1648_v20  ;;  %v1672_v27 = vpack.c.bf16 %v1662_v23, %v1661_v12 }
 0x83b   :  { %2205 = vmatmul.mubr.msk.bf16.gmra.mrb[24].mxu1 %vm1690_vm4, %v1670_v15  ;;  %v1673_v28 = vpack.c.bf16 %v1664_v26, %v1663_v63  ;;  %v1649_v29 = vmul.f32 0.2, %v1617_v24  ;;  %vm1633_vm3 = vcmp.ge.f32.partialorder %v1617_v24, 0.0 }
 0x83c   :  { %2208 = vmatprep.mubr.msk.bf16.mxu1 %vm1690_vm4, %v1671_v16  ;;  %v1650_v30 = vmul.f32 0.2, %v1618_v25  ;;  %vm1634_vm5 = vcmp.ge.f32.partialorder %v1618_v25, 0.0 }
 0x83d   :  { %v1665_v31 = vsel %vm1633_vm3, %v1617_v24, %v1649_v29 }
 0x83e   :  { %v1666_v32 = vsel %vm1634_vm5, %v1618_v25, %v1650_v30 }
 0x83f   :  { %v1674_v33 = vpack.c.bf16 %v1666_v32, %v1665_v31 }
 0x843   :  { %2209 = vmatmul.mubr.msk.bf16.gmra.mrb[28].mxu1 %vm1690_vm4, %v1672_v27 }
 0x844   :  { %2212 = vmatprep.mubr.msk.bf16.mxu1 %vm1690_vm4, %v1673_v28 }
 0x84b   :  { %2213 = vmatmul.mubr.msk.bf16.gmra.mrb[32].mxu1 %vm1690_vm4, %v1674_v33 }
 0x906   :  { %v2202_v34 = vpop.f32.mrb[20].mxu1 }
 0x907   :  { %v1758_v35 = vadd.f32 %v2202_v34, %v1941_v13  ;;  %v1749_v9 = vpop.f32.mrb[21].mxu1 }
 0x908   :  { %v1750_v36 = vadd.f32 %v1941_v13, %v1749_v9  ;;  %v2203_v37 = vpop.f32.mrb[22].mxu1 }
 0x909   :  { %1814 = vst [vmem:[%s2938_s21 + $0x10] sm:$0xff] %v1758_v35  ;;  %v1761_v38 = vadd.f32 %v2203_v37, %v1941_v13  ;;  %v1752_v40 = vpop.f32.mrb[23].mxu1 }
 0x90a   :  { %1812 = vst [vmem:[%s2938_s21] sm:$0xff] %v1750_v36  ;;  %v1753_v10 = vadd.f32 %v1941_v13, %v1752_v40 }
 0x90b   :  { %1815 = vst [vmem:[%s2938_s21 + $0x18] sm:$0xff] %v1761_v38 }
 0x90c   :  { %1813 = vst [vmem:[%s2938_s21 + $0x8] sm:$0xff] %v1753_v10 }
 0x90e   :  { %v2206_v41 = vpop.f32.mrb[24].mxu1 }
 0x90f   :  { %v1774_v42 = vadd.f32 %v2206_v41, %v1941_v13  ;;  %v1765_v43 = vpop.f32.mrb[25].mxu1 }
 0x910   :  { %v1766_v44 = vadd.f32 %v1941_v13, %v1765_v43  ;;  %v2207_v45 = vpop.f32.mrb[26].mxu1 }
 0x911   :  { %1818 = vst [vmem:[%s2938_s21 + $0x30] sm:$0xff] %v1774_v42  ;;  %v1777_v46 = vadd.f32 %v2207_v45, %v1941_v13  ;;  %v1768_v47 = vpop.f32.mrb[27].mxu1 }
 0x912   :  { %1816 = vst [vmem:[%s2938_s21 + $0x20] sm:$0xff] %v1766_v44  ;;  %v1769_v48 = vadd.f32 %v1941_v13, %v1768_v47 }
 0x913   :  { %1819 = vst [vmem:[%s2938_s21 + $0x38] sm:$0xff] %v1777_v46 }
 0x914   :  { %1817 = vst [vmem:[%s2938_s21 + $0x28] sm:$0xff] %v1769_v48 }
 0x916   :  { %v2210_v49 = vpop.f32.mrb[28].mxu1 }
 0x917   :  { %v1790_v50 = vadd.f32 %v2210_v49, %v1941_v13  ;;  %v1781_v51 = vpop.f32.mrb[29].mxu1 }
 0x918   :  { %v1782_v39 = vadd.f32 %v1941_v13, %v1781_v51  ;;  %v2211_v52 = vpop.f32.mrb[30].mxu1 }
 0x919   :  { %1822 = vst [vmem:[%s2938_s21 + $0x50] sm:$0xff] %v1790_v50  ;;  %v1793_v53 = vadd.f32 %v2211_v52, %v1941_v13  ;;  %v1784_v54 = vpop.f32.mrb[31].mxu1 }
 0x91a   :  { %1820 = vst [vmem:[%s2938_s21 + $0x40] sm:$0xff] %v1782_v39  ;;  %v1785_v55 = vadd.f32 %v1941_v13, %v1784_v54 }
 0x91b   :  { %1823 = vst [vmem:[%s2938_s21 + $0x58] sm:$0xff] %v1793_v53 }
 0x91c   :  { %1821 = vst [vmem:[%s2938_s21 + $0x48] sm:$0xff] %v1785_v55 }
 0x91e   :  { %v2214_v56 = vpop.f32.mrb[32].mxu1 }
 0x91f   :  { %v1806_v57 = vadd.f32 %v2214_v56, %v1941_v13  ;;  %v1797_v58 = vpop.f32.mrb[33].mxu1 }
 0x920   :  { %v1798_v59 = vadd.f32 %v1941_v13, %v1797_v58  ;;  %v2215_v61 = vpop.f32.mrb[34].mxu1 }
 0x921   :  { %1826 = vst [vmem:[%s2938_s21 + $0x70] sm:$0xff] %v1806_v57  ;;  %v1809_v62 = vadd.f32 %v2215_v61, %v1941_v13  ;;  %v1800_v60 = vpop.f32.mrb[35].mxu1 }
 0x922   :  { %1824 = vst [vmem:[%s2938_s21 + $0x60] sm:$0xff] %v1798_v59  ;;  %v1801_v0 = vadd.f32 %v1941_v13, %v1800_v60 }
 0x923   :  { %1827 = vst [vmem:[%s2938_s21 + $0x78] sm:$0xff] %v1809_v62 }
 0x924   :  { %1825 = vst [vmem:[%s2938_s21 + $0x68] sm:$0xff] %v1801_v0 }

</bundles_post_ra>
